<compile_context>
chip_gen: v7x
topology: tpu7x:2x2x1
jax: 0.10.0
libtpu: 0.0.40
codegen_flags: <defaults>
</compile_context>

<pallas_src>
import functools
import math

import jax
import jax.numpy as jnp
from jax import lax
from jax.experimental import pallas as pl
from jax.experimental.pallas import tpu as pltpu


def _layernorm(v, gamma, beta, eps=1e-5):
    mean = jnp.mean(v, axis=-1, keepdims=True)
    var = jnp.mean((v - mean) ** 2, axis=-1, keepdims=True)
    return (v - mean) * lax.rsqrt(var + eps) * gamma + beta


def decoder_kernel(x_ref, mask_ref, ln1_g_ref, ln1_b_ref,
                   wproj_ref, bproj_ref, c0_ref,
                   ln2_g_ref, ln2_b_ref,
                   w1_ref, b1_ref, w2_ref, b2_ref,
                   wout_ref, bout_ref,
                   o_ref, *, B, D, heads, c1, cw):
    f32 = jnp.float32
    inv_sqrt_c1 = 1.0 / math.sqrt(c1)

    x = x_ref[...]                                           # (B, D) f32
    xn = _layernorm(x, ln1_g_ref[...], ln1_b_ref[...])       # in_norm_layer (VPU, f32)
    res1 = xn                                                # dropout (eval) == identity

    # Single fused projection matmul for all heads:
    #   chunks [0, heads*c1)            -> Q[h, t]      (D lanes each, 128-aligned page)
    #   chunks [heads*c1, 2*heads*c1)   -> K[h, t]
    #   chunks [2*heads*c1, +heads)     -> V folded with proj_z * proj_w
    # Default (single-pass bf16) MXU precision; accumulation in f32.
    proj = jnp.dot(xn, wproj_ref[...], preferred_element_type=f32) + bproj_ref[...]

    nqk = heads * c1

    def chunk(idx):                                          # 128-aligned lane slice
        return proj[:, idx * cw: idx * cw + D]               # (B, D)

    qblk = [chunk(h * c1 + t) for h in range(heads) for t in range(c1)]
    kblk = [chunk(nqk + h * c1 + t) for h in range(heads) for t in range(c1)]
    vblk = [chunk(2 * nqk + h) for h in range(heads)]        # proj_z/proj_w already folded

    mask_add = mask_ref[...]                                 # (D, D): 0 / -1e9 additive mask

    # TODO(synk): B*heads is tiny here; for production shapes move this loop onto a
    # ("parallel",) grid axis (shards across v7x's 2 TensorCores) instead of unrolling.
    mha_rows = []
    for b in range(B):
        acc = jnp.zeros((1, D), f32)
        for h in range(heads):
            qT = jnp.concatenate(
                [qblk[h * c1 + t][b:b + 1, :] for t in range(c1)], axis=0)   # (c1, D)
            kT = jnp.concatenate(
                [kblk[h * c1 + t][b:b + 1, :] for t in range(c1)], axis=0)   # (c1, D)
            # S[i, j] = sum_t Q[b,i,t] * K[b,j,t] / sqrt(c1); contraction on dim 0 keeps
            # the transpose on the MXU operand path (no materialized .T).
            s = lax.dot_general(qT, kT, (((0,), (0,)), ((), ())),
                                preferred_element_type=f32) * inv_sqrt_c1
            s = s + mask_add                                  # causal mask (additive)
            s = s - jnp.max(s, axis=-1, keepdims=True)
            p = jnp.exp(s)
            p = p * pl.reciprocal(jnp.sum(p, axis=-1, keepdims=True), approx=True)
            # z[i] = sum_j vz[j] * p[i, j]   (vz already carries Wz and Ww scaling)
            vz = vblk[h][b:b + 1, :]                          # (1, D)
            acc = acc + lax.dot_general(vz, p, (((1,), (1,)), ((), ())),
                                        preferred_element_type=f32)
        mha_rows.append(acc)
    mha = jnp.concatenate(mha_rows, axis=0) + c0_ref[0, 0]    # (B, D); c0 = sum_h Ww*bz + bw

    x1 = res1 + mha                                           # in_skip_connection
    res2 = _layernorm(x1, ln2_g_ref[...], ln2_b_ref[...])     # hid_norm_layer
    hid = jnp.maximum(
        jnp.dot(res2, w1_ref[...], preferred_element_type=f32) + b1_ref[...], 0.0)
    ff = jnp.dot(hid, w2_ref[...], preferred_element_type=f32) + b2_ref[...]
    x2 = res2 + ff                                            # hid_skip_connection
    # lane-dense output: (1, B) with batch on lanes instead of (B, 1)
    out = lax.dot_general(wout_ref[...], x2, (((1,), (1,)), ((), ())),
                          preferred_element_type=f32) + bout_ref[0, 0]
    o_ref[...] = out.astype(o_ref.dtype)                      # (1, B)


def _to_kernel_params(p, heads, D, c1):
    """Convert torch-layout parameters into the fused / folded kernel layout."""
    f32 = jnp.float32
    CW = ((D + 127) // 128) * 128                             # per-chunk lane page width

    def qkv_packed(W):   # (heads, c1*D, D) -> (heads*c1, D, D); [h*c1+t, k, i] = W[h, i*c1+t, k]
        W = W.reshape(heads, D, c1, D)                        # [h, i, t, k]
        W = jnp.transpose(W, (0, 2, 3, 1))                    # [h, t, k, i]
        return W.reshape(heads * c1, D, D)

    def qkv_bias(b):     # (heads, c1*D) -> (heads*c1, D); [h*c1+t, i] = b[h, i*c1+t]
        b = b.reshape(heads, D, c1)                           # [h, i, t]
        b = jnp.transpose(b, (0, 2, 1))                       # [h, t, i]
        return b.reshape(heads * c1, D)

    def pad_w(chunks):   # (n, D, D) -> (D, n*CW): each chunk in its own 128-aligned page
        n = chunks.shape[0]
        padded = jnp.zeros((n, D, CW), f32).at[:, :, :D].set(chunks)
        return jnp.transpose(padded, (1, 0, 2)).reshape(D, n * CW)

    def pad_b(chunks):   # (n, D) -> (1, n*CW)
        n = chunks.shape[0]
        padded = jnp.zeros((n, CW), f32).at[:, :D].set(chunks)
        return padded.reshape(1, n * CW)

    wq, bq = qkv_packed(p["Wq"]), qkv_bias(p["bq"])
    wk, bk = qkv_packed(p["Wk"]), qkv_bias(p["bk"])
    wv, bv = qkv_packed(p["Wv"]), qkv_bias(p["bv"])

    # Fold proj_z (Wz, bz) and per-head proj_w scale (Ww) into V (exact, linear):
    #   Wv_folded[h, k, j] = Ww[h] * sum_t Wz[t] * Wv[h, j*c1+t, k]
    wz = p["Wz"].reshape(c1)
    ww = p["Ww"].reshape(heads)
    wv4 = wv.reshape(heads, c1, D, D)
    bv4 = bv.reshape(heads, c1, D)
    wv_f = jnp.einsum("h,t,htkj->hkj", ww, wz, wv4)
    bv_f = jnp.einsum("h,t,htj->hj", ww, wz, bv4)
    c0 = jnp.sum(ww) * p["bz"].reshape(()) + p["bw"].reshape(())   # sum_h Ww[h]*bz + bw

    w_wide = jnp.concatenate([pad_w(wq), pad_w(wk), pad_w(wv_f)], axis=1)
    b_wide = jnp.concatenate([pad_b(bq), pad_b(bk), pad_b(bv_f)], axis=1)

    row = jnp.arange(D)[:, None]
    col = jnp.arange(D)[None, :]
    mask_add = jnp.where(col <= row, 0.0, -1.0e9).astype(f32)       # additive causal mask

    args = [
        mask_add,
        p["ln1_g"].reshape(1, D), p["ln1_b"].reshape(1, D),
        w_wide, b_wide, c0.reshape(1, 1).astype(f32),
        p["ln2_g"].reshape(1, D), p["ln2_b"].reshape(1, D),
        p["W1"].T, p["b1"].reshape(1, -1),
        p["W2"].T, p["b2"].reshape(1, -1),
        p["Wo"].reshape(1, D), p["bo"].reshape(1, 1),
    ]
    return CW, args


def decoder_forward(x, params, *, heads, c1):
    B, D = x.shape
    cw, kp = _to_kernel_params(params, heads, D, c1)
    kernel = functools.partial(decoder_kernel, B=B, D=D, heads=heads, c1=c1, cw=cw)
    vmem = pltpu.MemorySpace.VMEM
    smem = pltpu.MemorySpace.SMEM
    # arg order: x, mask, ln1_g, ln1_b, w_wide, b_wide, c0(SMEM),
    #            ln2_g, ln2_b, W1, b1, W2, b2, Wo, bo(SMEM)
    spaces = [vmem] * 6 + [smem] + [vmem] * 7 + [smem]
    out = pl.pallas_call(
        kernel,
        out_shape=jax.ShapeDtypeStruct((1, B), jnp.float32),
        in_specs=[pl.BlockSpec(memory_space=s) for s in spaces],
        out_specs=pl.BlockSpec(memory_space=vmem),
    )(x, *kp)
    return out[0]                                             # (B,) == torch .squeeze(dim=1)


def init_params(key, heads, d_model, c1, c_ff, n_out=1):
    """Deterministic synthetic parameters in PyTorch layout (Linear weight = (out, in)).
    The reference module builds heads via deepcopy (identical init); here each head gets
    its own deterministic parameters, which only generalizes the same forward math."""
    D, Dff = d_model, c_ff * d_model
    ks = iter(jax.random.split(key, 24))
    n = lambda shape, s=0.1: s * jax.random.normal(next(ks), shape, jnp.float32)
    return {
        "ln1_g": 1.0 + n((D,)), "ln1_b": n((D,)),
        "Wq": n((heads, c1 * D, D)), "bq": n((heads, c1 * D)),
        "Wk": n((heads, c1 * D, D)), "bk": n((heads, c1 * D)),
        "Wv": n((heads, c1 * D, D)), "bv": n((heads, c1 * D)),
        "Wz": n((1, c1)), "bz": n((1,)),
        "Ww": n((1, heads)), "bw": n((1,)),
        "ln2_g": 1.0 + n((D,)), "ln2_b": n((D,)),
        "W1": n((Dff, D)), "b1": n((Dff,)),
        "W2": n((D, Dff)), "b2": n((D,)),
        "Wo": n((n_out, D)), "bo": n((n_out,)),
    }


def decoder_reference(x, p, *, heads, c1):
    """Plain-JAX mirror of the PyTorch forward (eval mode), for validation."""
    B, D = x.shape
    ln = lambda v, g, b: (v - jnp.mean(v, -1, keepdims=True)) / jnp.sqrt(
        jnp.var(v, -1, keepdims=True) + 1e-5) * g + b
    lin = lambda v, W, b: v @ W.T + b
    xn = ln(x, p["ln1_g"], p["ln1_b"])
    res = xn
    keep = jnp.triu(jnp.ones((1, D, D)), 1) == 0
    outs = []
    for h in range(heads):
        Q = lin(xn, p["Wq"][h], p["bq"][h]).reshape(B, 1, -1, c1)
        K = lin(xn, p["Wk"][h], p["bk"][h]).reshape(B, 1, -1, c1)
        V = lin(xn, p["Wv"][h], p["bv"][h]).reshape(B, 1, -1, c1)
        att = jnp.matmul(Q, jnp.swapaxes(K, -2, -1)) / math.sqrt(c1)
        att = jnp.where(keep, att, -1.0e9)
        att = jax.nn.softmax(att, axis=-1)
        outs.append(jnp.matmul(att, V))
    conc = jnp.concatenate(outs, axis=1)                      # (B, heads, D, c1)
    z = jnp.swapaxes(lin(conc, p["Wz"], p["bz"]), 1, 3)       # (B, 1, D, heads)
    w = lin(z, p["Ww"], p["bw"])                              # (B, 1, D, 1)
    x1 = res + jnp.squeeze(w)                                 # torch.squeeze
    res2 = ln(x1, p["ln2_g"], p["ln2_b"])
    ff = lin(jnp.maximum(lin(res2, p["W1"], p["b1"]), 0.0), p["W2"], p["b2"])
    x2 = res2 + ff
    return jnp.squeeze(lin(x2, p["Wo"], p["bo"]), axis=1)


if __name__ == "__main__":
    heads, d_model, c1, c_ff = 4, 32, 4, 4
    B = 2
    assert d_model % heads == 0

    key = jax.random.PRNGKey(0)
    kx, kp = jax.random.split(key)
    x = jax.random.normal(kx, (B, d_model), jnp.float32)
    params = init_params(kp, heads, d_model, c1, c_ff)

    y = jax.block_until_ready(decoder_forward(x, params, heads=heads, c1=c1))

    # Accurate f32 baseline for validation (kernel MXU math runs at default bf16-pass
    # precision, so compare at bf16-class tolerance).
    with jax.default_matmul_precision("highest"):
        y_ref = jax.block_until_ready(decoder_reference(x, params, heads=heads, c1=c1))

    assert y.shape == (B,)
    if not bool(jnp.allclose(y, y_ref, rtol=2e-2, atol=2e-2)):
        raise AssertionError(f"kernel/reference mismatch: {y} vs {y_ref}")
    print("KERNEL_OK")
</pallas_src>

<mosaic_0001>
module attributes {stable_mosaic.version = 11 : i64} {
  func.func @decoder_kernel(%arg0: memref<2x32xf32, #tpu.memory_space<vmem>>, %arg1: memref<32x32xf32, #tpu.memory_space<vmem>>, %arg2: memref<1x32xf32, #tpu.memory_space<vmem>>, %arg3: memref<1x32xf32, #tpu.memory_space<vmem>>, %arg4: memref<32x4608xf32, #tpu.memory_space<vmem>>, %arg5: memref<1x4608xf32, #tpu.memory_space<vmem>>, %arg6: memref<1x1xf32, #tpu.memory_space<smem>>, %arg7: memref<1x32xf32, #tpu.memory_space<vmem>>, %arg8: memref<1x32xf32, #tpu.memory_space<vmem>>, %arg9: memref<32x128xf32, #tpu.memory_space<vmem>>, %arg10: memref<1x128xf32, #tpu.memory_space<vmem>>, %arg11: memref<128x32xf32, #tpu.memory_space<vmem>>, %arg12: memref<1x32xf32, #tpu.memory_space<vmem>>, %arg13: memref<1x32xf32, #tpu.memory_space<vmem>>, %arg14: memref<1x1xf32, #tpu.memory_space<smem>>, %arg15: memref<1x2xf32, #tpu.memory_space<vmem>>) attributes {dimension_semantics = [], scalar_prefetch = 0 : i64, scratch_operands = 0 : i64, tpu.core_type = #tpu.core_type<tc>} {
    %c0 = arith.constant 0 : index
    %c0_0 = arith.constant 0 : index
    %0 = vector.load %arg0[%c0, %c0_0] : memref<2x32xf32, #tpu.memory_space<vmem>>, vector<2x32xf32>
    %c0_1 = arith.constant 0 : index
    %c0_2 = arith.constant 0 : index
    %1 = vector.load %arg2[%c0_1, %c0_2] : memref<1x32xf32, #tpu.memory_space<vmem>>, vector<1x32xf32>
    %c0_3 = arith.constant 0 : index
    %c0_4 = arith.constant 0 : index
    %2 = vector.load %arg3[%c0_3, %c0_4] : memref<1x32xf32, #tpu.memory_space<vmem>>, vector<1x32xf32>
    %cst = arith.constant dense<0.000000e+00> : vector<2xf32>
    %3 = vector.multi_reduction <add>, %0, %cst [1] : vector<2x32xf32> to vector<2xf32>
    %4 = vector.shape_cast %3 : vector<2xf32> to vector<2x1xf32>
    %cst_5 = arith.constant 3.200000e+01 : f32
    %5 = vector.broadcast %cst_5 : f32 to vector<2x1xf32>
    %6 = arith.divf %4, %5 : vector<2x1xf32>
    %7 = vector.broadcast %6 : vector<2x1xf32> to vector<2x32xf32>
    %8 = arith.subf %0, %7 : vector<2x32xf32>
    %9 = arith.mulf %8, %8 : vector<2x32xf32>
    %cst_6 = arith.constant dense<0.000000e+00> : vector<2xf32>
    %10 = vector.multi_reduction <add>, %9, %cst_6 [1] : vector<2x32xf32> to vector<2xf32>
    %11 = vector.shape_cast %10 : vector<2xf32> to vector<2x1xf32>
    %cst_7 = arith.constant 3.200000e+01 : f32
    %12 = vector.broadcast %cst_7 : f32 to vector<2x1xf32>
    %13 = arith.divf %11, %12 : vector<2x1xf32>
    %14 = vector.broadcast %6 : vector<2x1xf32> to vector<2x32xf32>
    %15 = arith.subf %0, %14 : vector<2x32xf32>
    %cst_8 = arith.constant 9.99999974E-6 : f32
    %16 = vector.broadcast %cst_8 : f32 to vector<2x1xf32>
    %17 = arith.addf %13, %16 : vector<2x1xf32>
    %18 = math.rsqrt %17 : vector<2x1xf32>
    %19 = vector.broadcast %18 : vector<2x1xf32> to vector<2x32xf32>
    %20 = arith.mulf %15, %19 : vector<2x32xf32>
    %21 = vector.broadcast %1 : vector<1x32xf32> to vector<2x32xf32>
    %22 = arith.mulf %20, %21 : vector<2x32xf32>
    %23 = vector.broadcast %2 : vector<1x32xf32> to vector<2x32xf32>
    %24 = arith.addf %22, %23 : vector<2x32xf32>
    %c0_9 = arith.constant 0 : index
    %c0_10 = arith.constant 0 : index
    %25 = vector.load %arg4[%c0_9, %c0_10] : memref<32x4608xf32, #tpu.memory_space<vmem>>, vector<32x4608xf32>
    %cst_11 = arith.constant dense<0.000000e+00> : vector<2x4608xf32>
    %26 = tpu.matmul %24, %25, %cst_11 {dimension_numbers = #tpu.dot_dimension_numbers<[1], [0], [0], [1], [0, 0, 1, 1], [], []>} : vector<2x32xf32>, vector<32x4608xf32>, vector<2x4608xf32> -> vector<2x4608xf32>
    %c0_12 = arith.constant 0 : index
    %c0_13 = arith.constant 0 : index
    %27 = vector.load %arg5[%c0_12, %c0_13] : memref<1x4608xf32, #tpu.memory_space<vmem>>, vector<1x4608xf32>
    %28 = vector.broadcast %27 : vector<1x4608xf32> to vector<2x4608xf32>
    %29 = arith.addf %26, %28 : vector<2x4608xf32>
    %30 = vector.extract_strided_slice %29 {offsets = [0, 0], sizes = [2, 32], strides = [1, 1]} : vector<2x4608xf32> to vector<2x32xf32>
    %31 = vector.extract_strided_slice %29 {offsets = [0, 128], sizes = [2, 32], strides = [1, 1]} : vector<2x4608xf32> to vector<2x32xf32>
    %32 = vector.extract_strided_slice %29 {offsets = [0, 256], sizes = [2, 32], strides = [1, 1]} : vector<2x4608xf32> to vector<2x32xf32>
    %33 = vector.extract_strided_slice %29 {offsets = [0, 384], sizes = [2, 32], strides = [1, 1]} : vector<2x4608xf32> to vector<2x32xf32>
    %34 = vector.extract_strided_slice %29 {offsets = [0, 512], sizes = [2, 32], strides = [1, 1]} : vector<2x4608xf32> to vector<2x32xf32>
    %35 = vector.extract_strided_slice %29 {offsets = [0, 640], sizes = [2, 32], strides = [1, 1]} : vector<2x4608xf32> to vector<2x32xf32>
    %36 = vector.extract_strided_slice %29 {offsets = [0, 768], sizes = [2, 32], strides = [1, 1]} : vector<2x4608xf32> to vector<2x32xf32>
    %37 = vector.extract_strided_slice %29 {offsets = [0, 896], sizes = [2, 32], strides = [1, 1]} : vector<2x4608xf32> to vector<2x32xf32>
    %38 = vector.extract_strided_slice %29 {offsets = [0, 1024], sizes = [2, 32], strides = [1, 1]} : vector<2x4608xf32> to vector<2x32xf32>
    %39 = vector.extract_strided_slice %29 {offsets = [0, 1152], sizes = [2, 32], strides = [1, 1]} : vector<2x4608xf32> to vector<2x32xf32>
    %40 = vector.extract_strided_slice %29 {offsets = [0, 1280], sizes = [2, 32], strides = [1, 1]} : vector<2x4608xf32> to vector<2x32xf32>
    %41 = vector.extract_strided_slice %29 {offsets = [0, 1408], sizes = [2, 32], strides = [1, 1]} : vector<2x4608xf32> to vector<2x32xf32>
    %42 = vector.extract_strided_slice %29 {offsets = [0, 1536], sizes = [2, 32], strides = [1, 1]} : vector<2x4608xf32> to vector<2x32xf32>
    %43 = vector.extract_strided_slice %29 {offsets = [0, 1664], sizes = [2, 32], strides = [1, 1]} : vector<2x4608xf32> to vector<2x32xf32>
    %44 = vector.extract_strided_slice %29 {offsets = [0, 1792], sizes = [2, 32], strides = [1, 1]} : vector<2x4608xf32> to vector<2x32xf32>
    %45 = vector.extract_strided_slice %29 {offsets = [0, 1920], sizes = [2, 32], strides = [1, 1]} : vector<2x4608xf32> to vector<2x32xf32>
    %46 = vector.extract_strided_slice %29 {offsets = [0, 2048], sizes = [2, 32], strides = [1, 1]} : vector<2x4608xf32> to vector<2x32xf32>
    %47 = vector.extract_strided_slice %29 {offsets = [0, 2176], sizes = [2, 32], strides = [1, 1]} : vector<2x4608xf32> to vector<2x32xf32>
    %48 = vector.extract_strided_slice %29 {offsets = [0, 2304], sizes = [2, 32], strides = [1, 1]} : vector<2x4608xf32> to vector<2x32xf32>
    %49 = vector.extract_strided_slice %29 {offsets = [0, 2432], sizes = [2, 32], strides = [1, 1]} : vector<2x4608xf32> to vector<2x32xf32>
    %50 = vector.extract_strided_slice %29 {offsets = [0, 2560], sizes = [2, 32], strides = [1, 1]} : vector<2x4608xf32> to vector<2x32xf32>
    %51 = vector.extract_strided_slice %29 {offsets = [0, 2688], sizes = [2, 32], strides = [1, 1]} : vector<2x4608xf32> to vector<2x32xf32>
    %52 = vector.extract_strided_slice %29 {offsets = [0, 2816], sizes = [2, 32], strides = [1, 1]} : vector<2x4608xf32> to vector<2x32xf32>
    %53 = vector.extract_strided_slice %29 {offsets = [0, 2944], sizes = [2, 32], strides = [1, 1]} : vector<2x4608xf32> to vector<2x32xf32>
    %54 = vector.extract_strided_slice %29 {offsets = [0, 3072], sizes = [2, 32], strides = [1, 1]} : vector<2x4608xf32> to vector<2x32xf32>
    %55 = vector.extract_strided_slice %29 {offsets = [0, 3200], sizes = [2, 32], strides = [1, 1]} : vector<2x4608xf32> to vector<2x32xf32>
    %56 = vector.extract_strided_slice %29 {offsets = [0, 3328], sizes = [2, 32], strides = [1, 1]} : vector<2x4608xf32> to vector<2x32xf32>
    %57 = vector.extract_strided_slice %29 {offsets = [0, 3456], sizes = [2, 32], strides = [1, 1]} : vector<2x4608xf32> to vector<2x32xf32>
    %58 = vector.extract_strided_slice %29 {offsets = [0, 3584], sizes = [2, 32], strides = [1, 1]} : vector<2x4608xf32> to vector<2x32xf32>
    %59 = vector.extract_strided_slice %29 {offsets = [0, 3712], sizes = [2, 32], strides = [1, 1]} : vector<2x4608xf32> to vector<2x32xf32>
    %60 = vector.extract_strided_slice %29 {offsets = [0, 3840], sizes = [2, 32], strides = [1, 1]} : vector<2x4608xf32> to vector<2x32xf32>
    %61 = vector.extract_strided_slice %29 {offsets = [0, 3968], sizes = [2, 32], strides = [1, 1]} : vector<2x4608xf32> to vector<2x32xf32>
    %62 = vector.extract_strided_slice %29 {offsets = [0, 4096], sizes = [2, 32], strides = [1, 1]} : vector<2x4608xf32> to vector<2x32xf32>
    %63 = vector.extract_strided_slice %29 {offsets = [0, 4224], sizes = [2, 32], strides = [1, 1]} : vector<2x4608xf32> to vector<2x32xf32>
    %64 = vector.extract_strided_slice %29 {offsets = [0, 4352], sizes = [2, 32], strides = [1, 1]} : vector<2x4608xf32> to vector<2x32xf32>
    %65 = vector.extract_strided_slice %29 {offsets = [0, 4480], sizes = [2, 32], strides = [1, 1]} : vector<2x4608xf32> to vector<2x32xf32>
    %c0_14 = arith.constant 0 : index
    %c0_15 = arith.constant 0 : index
    %66 = vector.load %arg1[%c0_14, %c0_15] : memref<32x32xf32, #tpu.memory_space<vmem>>, vector<32x32xf32>
    %cst_16 = arith.constant 0.000000e+00 : f32
    %67 = vector.broadcast %cst_16 : f32 to vector<1x32xf32>
    %68 = vector.extract_strided_slice %30 {offsets = [0, 0], sizes = [1, 32], strides = [1, 1]} : vector<2x32xf32> to vector<1x32xf32>
    %69 = vector.extract_strided_slice %31 {offsets = [0, 0], sizes = [1, 32], strides = [1, 1]} : vector<2x32xf32> to vector<1x32xf32>
    %70 = vector.extract_strided_slice %32 {offsets = [0, 0], sizes = [1, 32], strides = [1, 1]} : vector<2x32xf32> to vector<1x32xf32>
    %71 = vector.extract_strided_slice %33 {offsets = [0, 0], sizes = [1, 32], strides = [1, 1]} : vector<2x32xf32> to vector<1x32xf32>
    %72 = tpu.concatenate %68, %69, %70, %71 in 0 : vector<1x32xf32>, vector<1x32xf32>, vector<1x32xf32>, vector<1x32xf32> -> vector<4x32xf32>
    %73 = vector.extract_strided_slice %46 {offsets = [0, 0], sizes = [1, 32], strides = [1, 1]} : vector<2x32xf32> to vector<1x32xf32>
    %74 = vector.extract_strided_slice %47 {offsets = [0, 0], sizes = [1, 32], strides = [1, 1]} : vector<2x32xf32> to vector<1x32xf32>
    %75 = vector.extract_strided_slice %48 {offsets = [0, 0], sizes = [1, 32], strides = [1, 1]} : vector<2x32xf32> to vector<1x32xf32>
    %76 = vector.extract_strided_slice %49 {offsets = [0, 0], sizes = [1, 32], strides = [1, 1]} : vector<2x32xf32> to vector<1x32xf32>
    %77 = tpu.concatenate %73, %74, %75, %76 in 0 : vector<1x32xf32>, vector<1x32xf32>, vector<1x32xf32>, vector<1x32xf32> -> vector<4x32xf32>
    %cst_17 = arith.constant dense<0.000000e+00> : vector<32x32xf32>
    %78 = tpu.matmul %72, %77, %cst_17 {dimension_numbers = #tpu.dot_dimension_numbers<[0], [0], [1], [1], [0, 1, 1, 1], [], []>} : vector<4x32xf32>, vector<4x32xf32>, vector<32x32xf32> -> vector<32x32xf32>
    %cst_18 = arith.constant 5.000000e-01 : f32
    %79 = vector.broadcast %cst_18 : f32 to vector<32x32xf32>
    %80 = arith.mulf %78, %79 : vector<32x32xf32>
    %81 = arith.addf %80, %66 : vector<32x32xf32>
    %cst_19 = arith.constant dense<0xFF800000> : vector<32xf32>
    %82 = vector.multi_reduction <maximumf>, %81, %cst_19 [1] : vector<32x32xf32> to vector<32xf32>
    %83 = vector.shape_cast %82 : vector<32xf32> to vector<32x1xf32>
    %84 = vector.broadcast %83 : vector<32x1xf32> to vector<32x32xf32>
    %85 = arith.subf %81, %84 : vector<32x32xf32>
    %86 = math.exp %85 : vector<32x32xf32>
    %cst_20 = arith.constant dense<0.000000e+00> : vector<32xf32>
    %87 = vector.multi_reduction <add>, %86, %cst_20 [1] : vector<32x32xf32> to vector<32xf32>
    %88 = vector.shape_cast %87 : vector<32xf32> to vector<32x1xf32>
    %89 = tpu.reciprocal %88 {approx = true} : vector<32x1xf32> -> vector<32x1xf32>
    %90 = vector.broadcast %89 : vector<32x1xf32> to vector<32x32xf32>
    %91 = arith.mulf %86, %90 : vector<32x32xf32>
    %92 = vector.extract_strided_slice %62 {offsets = [0, 0], sizes = [1, 32], strides = [1, 1]} : vector<2x32xf32> to vector<1x32xf32>
    %cst_21 = arith.constant dense<0.000000e+00> : vector<1x32xf32>
    %93 = tpu.matmul %92, %91, %cst_21 {dimension_numbers = #tpu.dot_dimension_numbers<[1], [1], [0], [0], [0, 0, 1, 0], [], []>} : vector<1x32xf32>, vector<32x32xf32>, vector<1x32xf32> -> vector<1x32xf32>
    %94 = arith.addf %67, %93 : vector<1x32xf32>
    %95 = vector.extract_strided_slice %34 {offsets = [0, 0], sizes = [1, 32], strides = [1, 1]} : vector<2x32xf32> to vector<1x32xf32>
    %96 = vector.extract_strided_slice %35 {offsets = [0, 0], sizes = [1, 32], strides = [1, 1]} : vector<2x32xf32> to vector<1x32xf32>
    %97 = vector.extract_strided_slice %36 {offsets = [0, 0], sizes = [1, 32], strides = [1, 1]} : vector<2x32xf32> to vector<1x32xf32>
    %98 = vector.extract_strided_slice %37 {offsets = [0, 0], sizes = [1, 32], strides = [1, 1]} : vector<2x32xf32> to vector<1x32xf32>
    %99 = tpu.concatenate %95, %96, %97, %98 in 0 : vector<1x32xf32>, vector<1x32xf32>, vector<1x32xf32>, vector<1x32xf32> -> vector<4x32xf32>
    %100 = vector.extract_strided_slice %50 {offsets = [0, 0], sizes = [1, 32], strides = [1, 1]} : vector<2x32xf32> to vector<1x32xf32>
    %101 = vector.extract_strided_slice %51 {offsets = [0, 0], sizes = [1, 32], strides = [1, 1]} : vector<2x32xf32> to vector<1x32xf32>
    %102 = vector.extract_strided_slice %52 {offsets = [0, 0], sizes = [1, 32], strides = [1, 1]} : vector<2x32xf32> to vector<1x32xf32>
    %103 = vector.extract_strided_slice %53 {offsets = [0, 0], sizes = [1, 32], strides = [1, 1]} : vector<2x32xf32> to vector<1x32xf32>
    %104 = tpu.concatenate %100, %101, %102, %103 in 0 : vector<1x32xf32>, vector<1x32xf32>, vector<1x32xf32>, vector<1x32xf32> -> vector<4x32xf32>
    %cst_22 = arith.constant dense<0.000000e+00> : vector<32x32xf32>
    %105 = tpu.matmul %99, %104, %cst_22 {dimension_numbers = #tpu.dot_dimension_numbers<[0], [0], [1], [1], [0, 1, 1, 1], [], []>} : vector<4x32xf32>, vector<4x32xf32>, vector<32x32xf32> -> vector<32x32xf32>
    %cst_23 = arith.constant 5.000000e-01 : f32
    %106 = vector.broadcast %cst_23 : f32 to vector<32x32xf32>
    %107 = arith.mulf %105, %106 : vector<32x32xf32>
    %108 = arith.addf %107, %66 : vector<32x32xf32>
    %cst_24 = arith.constant dense<0xFF800000> : vector<32xf32>
    %109 = vector.multi_reduction <maximumf>, %108, %cst_24 [1] : vector<32x32xf32> to vector<32xf32>
    %110 = vector.shape_cast %109 : vector<32xf32> to vector<32x1xf32>
    %111 = vector.broadcast %110 : vector<32x1xf32> to vector<32x32xf32>
    %112 = arith.subf %108, %111 : vector<32x32xf32>
    %113 = math.exp %112 : vector<32x32xf32>
    %cst_25 = arith.constant dense<0.000000e+00> : vector<32xf32>
    %114 = vector.multi_reduction <add>, %113, %cst_25 [1] : vector<32x32xf32> to vector<32xf32>
    %115 = vector.shape_cast %114 : vector<32xf32> to vector<32x1xf32>
    %116 = tpu.reciprocal %115 {approx = true} : vector<32x1xf32> -> vector<32x1xf32>
    %117 = vector.broadcast %116 : vector<32x1xf32> to vector<32x32xf32>
    %118 = arith.mulf %113, %117 : vector<32x32xf32>
    %119 = vector.extract_strided_slice %63 {offsets = [0, 0], sizes = [1, 32], strides = [1, 1]} : vector<2x32xf32> to vector<1x32xf32>
    %cst_26 = arith.constant dense<0.000000e+00> : vector<1x32xf32>
    %120 = tpu.matmul %119, %118, %cst_26 {dimension_numbers = #tpu.dot_dimension_numbers<[1], [1], [0], [0], [0, 0, 1, 0], [], []>} : vector<1x32xf32>, vector<32x32xf32>, vector<1x32xf32> -> vector<1x32xf32>
    %121 = arith.addf %94, %120 : vector<1x32xf32>
    %122 = vector.extract_strided_slice %38 {offsets = [0, 0], sizes = [1, 32], strides = [1, 1]} : vector<2x32xf32> to vector<1x32xf32>
    %123 = vector.extract_strided_slice %39 {offsets = [0, 0], sizes = [1, 32], strides = [1, 1]} : vector<2x32xf32> to vector<1x32xf32>
    %124 = vector.extract_strided_slice %40 {offsets = [0, 0], sizes = [1, 32], strides = [1, 1]} : vector<2x32xf32> to vector<1x32xf32>
    %125 = vector.extract_strided_slice %41 {offsets = [0, 0], sizes = [1, 32], strides = [1, 1]} : vector<2x32xf32> to vector<1x32xf32>
    %126 = tpu.concatenate %122, %123, %124, %125 in 0 : vector<1x32xf32>, vector<1x32xf32>, vector<1x32xf32>, vector<1x32xf32> -> vector<4x32xf32>
    %127 = vector.extract_strided_slice %54 {offsets = [0, 0], sizes = [1, 32], strides = [1, 1]} : vector<2x32xf32> to vector<1x32xf32>
    %128 = vector.extract_strided_slice %55 {offsets = [0, 0], sizes = [1, 32], strides = [1, 1]} : vector<2x32xf32> to vector<1x32xf32>
    %129 = vector.extract_strided_slice %56 {offsets = [0, 0], sizes = [1, 32], strides = [1, 1]} : vector<2x32xf32> to vector<1x32xf32>
    %130 = vector.extract_strided_slice %57 {offsets = [0, 0], sizes = [1, 32], strides = [1, 1]} : vector<2x32xf32> to vector<1x32xf32>
    %131 = tpu.concatenate %127, %128, %129, %130 in 0 : vector<1x32xf32>, vector<1x32xf32>, vector<1x32xf32>, vector<1x32xf32> -> vector<4x32xf32>
    %cst_27 = arith.constant dense<0.000000e+00> : vector<32x32xf32>
    %132 = tpu.matmul %126, %131, %cst_27 {dimension_numbers = #tpu.dot_dimension_numbers<[0], [0], [1], [1], [0, 1, 1, 1], [], []>} : vector<4x32xf32>, vector<4x32xf32>, vector<32x32xf32> -> vector<32x32xf32>
    %cst_28 = arith.constant 5.000000e-01 : f32
    %133 = vector.broadcast %cst_28 : f32 to vector<32x32xf32>
    %134 = arith.mulf %132, %133 : vector<32x32xf32>
    %135 = arith.addf %134, %66 : vector<32x32xf32>
    %cst_29 = arith.constant dense<0xFF800000> : vector<32xf32>
    %136 = vector.multi_reduction <maximumf>, %135, %cst_29 [1] : vector<32x32xf32> to vector<32xf32>
    %137 = vector.shape_cast %136 : vector<32xf32> to vector<32x1xf32>
    %138 = vector.broadcast %137 : vector<32x1xf32> to vector<32x32xf32>
    %139 = arith.subf %135, %138 : vector<32x32xf32>
    %140 = math.exp %139 : vector<32x32xf32>
    %cst_30 = arith.constant dense<0.000000e+00> : vector<32xf32>
    %141 = vector.multi_reduction <add>, %140, %cst_30 [1] : vector<32x32xf32> to vector<32xf32>
    %142 = vector.shape_cast %141 : vector<32xf32> to vector<32x1xf32>
    %143 = tpu.reciprocal %142 {approx = true} : vector<32x1xf32> -> vector<32x1xf32>
    %144 = vector.broadcast %143 : vector<32x1xf32> to vector<32x32xf32>
    %145 = arith.mulf %140, %144 : vector<32x32xf32>
    %146 = vector.extract_strided_slice %64 {offsets = [0, 0], sizes = [1, 32], strides = [1, 1]} : vector<2x32xf32> to vector<1x32xf32>
    %cst_31 = arith.constant dense<0.000000e+00> : vector<1x32xf32>
    %147 = tpu.matmul %146, %145, %cst_31 {dimension_numbers = #tpu.dot_dimension_numbers<[1], [1], [0], [0], [0, 0, 1, 0], [], []>} : vector<1x32xf32>, vector<32x32xf32>, vector<1x32xf32> -> vector<1x32xf32>
    %148 = arith.addf %121, %147 : vector<1x32xf32>
    %149 = vector.extract_strided_slice %42 {offsets = [0, 0], sizes = [1, 32], strides = [1, 1]} : vector<2x32xf32> to vector<1x32xf32>
    %150 = vector.extract_strided_slice %43 {offsets = [0, 0], sizes = [1, 32], strides = [1, 1]} : vector<2x32xf32> to vector<1x32xf32>
    %151 = vector.extract_strided_slice %44 {offsets = [0, 0], sizes = [1, 32], strides = [1, 1]} : vector<2x32xf32> to vector<1x32xf32>
    %152 = vector.extract_strided_slice %45 {offsets = [0, 0], sizes = [1, 32], strides = [1, 1]} : vector<2x32xf32> to vector<1x32xf32>
    %153 = tpu.concatenate %149, %150, %151, %152 in 0 : vector<1x32xf32>, vector<1x32xf32>, vector<1x32xf32>, vector<1x32xf32> -> vector<4x32xf32>
    %154 = vector.extract_strided_slice %58 {offsets = [0, 0], sizes = [1, 32], strides = [1, 1]} : vector<2x32xf32> to vector<1x32xf32>
    %155 = vector.extract_strided_slice %59 {offsets = [0, 0], sizes = [1, 32], strides = [1, 1]} : vector<2x32xf32> to vector<1x32xf32>
    %156 = vector.extract_strided_slice %60 {offsets = [0, 0], sizes = [1, 32], strides = [1, 1]} : vector<2x32xf32> to vector<1x32xf32>
    %157 = vector.extract_strided_slice %61 {offsets = [0, 0], sizes = [1, 32], strides = [1, 1]} : vector<2x32xf32> to vector<1x32xf32>
    %158 = tpu.concatenate %154, %155, %156, %157 in 0 : vector<1x32xf32>, vector<1x32xf32>, vector<1x32xf32>, vector<1x32xf32> -> vector<4x32xf32>
    %cst_32 = arith.constant dense<0.000000e+00> : vector<32x32xf32>
    %159 = tpu.matmul %153, %158, %cst_32 {dimension_numbers = #tpu.dot_dimension_numbers<[0], [0], [1], [1], [0, 1, 1, 1], [], []>} : vector<4x32xf32>, vector<4x32xf32>, vector<32x32xf32> -> vector<32x32xf32>
    %cst_33 = arith.constant 5.000000e-01 : f32
    %160 = vector.broadcast %cst_33 : f32 to vector<32x32xf32>
    %161 = arith.mulf %159, %160 : vector<32x32xf32>
    %162 = arith.addf %161, %66 : vector<32x32xf32>
    %cst_34 = arith.constant dense<0xFF800000> : vector<32xf32>
    %163 = vector.multi_reduction <maximumf>, %162, %cst_34 [1] : vector<32x32xf32> to vector<32xf32>
    %164 = vector.shape_cast %163 : vector<32xf32> to vector<32x1xf32>
    %165 = vector.broadcast %164 : vector<32x1xf32> to vector<32x32xf32>
    %166 = arith.subf %162, %165 : vector<32x32xf32>
    %167 = math.exp %166 : vector<32x32xf32>
    %cst_35 = arith.constant dense<0.000000e+00> : vector<32xf32>
    %168 = vector.multi_reduction <add>, %167, %cst_35 [1] : vector<32x32xf32> to vector<32xf32>
    %169 = vector.shape_cast %168 : vector<32xf32> to vector<32x1xf32>
    %170 = tpu.reciprocal %169 {approx = true} : vector<32x1xf32> -> vector<32x1xf32>
    %171 = vector.broadcast %170 : vector<32x1xf32> to vector<32x32xf32>
    %172 = arith.mulf %167, %171 : vector<32x32xf32>
    %173 = vector.extract_strided_slice %65 {offsets = [0, 0], sizes = [1, 32], strides = [1, 1]} : vector<2x32xf32> to vector<1x32xf32>
    %cst_36 = arith.constant dense<0.000000e+00> : vector<1x32xf32>
    %174 = tpu.matmul %173, %172, %cst_36 {dimension_numbers = #tpu.dot_dimension_numbers<[1], [1], [0], [0], [0, 0, 1, 0], [], []>} : vector<1x32xf32>, vector<32x32xf32>, vector<1x32xf32> -> vector<1x32xf32>
    %175 = arith.addf %148, %174 : vector<1x32xf32>
    %cst_37 = arith.constant 0.000000e+00 : f32
    %176 = vector.broadcast %cst_37 : f32 to vector<1x32xf32>
    %177 = vector.extract_strided_slice %30 {offsets = [1, 0], sizes = [1, 32], strides = [1, 1]} : vector<2x32xf32> to vector<1x32xf32>
    %178 = vector.extract_strided_slice %31 {offsets = [1, 0], sizes = [1, 32], strides = [1, 1]} : vector<2x32xf32> to vector<1x32xf32>
    %179 = vector.extract_strided_slice %32 {offsets = [1, 0], sizes = [1, 32], strides = [1, 1]} : vector<2x32xf32> to vector<1x32xf32>
    %180 = vector.extract_strided_slice %33 {offsets = [1, 0], sizes = [1, 32], strides = [1, 1]} : vector<2x32xf32> to vector<1x32xf32>
    %181 = tpu.concatenate %177, %178, %179, %180 in 0 : vector<1x32xf32>, vector<1x32xf32>, vector<1x32xf32>, vector<1x32xf32> -> vector<4x32xf32>
    %182 = vector.extract_strided_slice %46 {offsets = [1, 0], sizes = [1, 32], strides = [1, 1]} : vector<2x32xf32> to vector<1x32xf32>
    %183 = vector.extract_strided_slice %47 {offsets = [1, 0], sizes = [1, 32], strides = [1, 1]} : vector<2x32xf32> to vector<1x32xf32>
    %184 = vector.extract_strided_slice %48 {offsets = [1, 0], sizes = [1, 32], strides = [1, 1]} : vector<2x32xf32> to vector<1x32xf32>
    %185 = vector.extract_strided_slice %49 {offsets = [1, 0], sizes = [1, 32], strides = [1, 1]} : vector<2x32xf32> to vector<1x32xf32>
    %186 = tpu.concatenate %182, %183, %184, %185 in 0 : vector<1x32xf32>, vector<1x32xf32>, vector<1x32xf32>, vector<1x32xf32> -> vector<4x32xf32>
    %cst_38 = arith.constant dense<0.000000e+00> : vector<32x32xf32>
    %187 = tpu.matmul %181, %186, %cst_38 {dimension_numbers = #tpu.dot_dimension_numbers<[0], [0], [1], [1], [0, 1, 1, 1], [], []>} : vector<4x32xf32>, vector<4x32xf32>, vector<32x32xf32> -> vector<32x32xf32>
    %cst_39 = arith.constant 5.000000e-01 : f32
    %188 = vector.broadcast %cst_39 : f32 to vector<32x32xf32>
    %189 = arith.mulf %187, %188 : vector<32x32xf32>
    %190 = arith.addf %189, %66 : vector<32x32xf32>
    %cst_40 = arith.constant dense<0xFF800000> : vector<32xf32>
    %191 = vector.multi_reduction <maximumf>, %190, %cst_40 [1] : vector<32x32xf32> to vector<32xf32>
    %192 = vector.shape_cast %191 : vector<32xf32> to vector<32x1xf32>
    %193 = vector.broadcast %192 : vector<32x1xf32> to vector<32x32xf32>
    %194 = arith.subf %190, %193 : vector<32x32xf32>
    %195 = math.exp %194 : vector<32x32xf32>
    %cst_41 = arith.constant dense<0.000000e+00> : vector<32xf32>
    %196 = vector.multi_reduction <add>, %195, %cst_41 [1] : vector<32x32xf32> to vector<32xf32>
    %197 = vector.shape_cast %196 : vector<32xf32> to vector<32x1xf32>
    %198 = tpu.reciprocal %197 {approx = true} : vector<32x1xf32> -> vector<32x1xf32>
    %199 = vector.broadcast %198 : vector<32x1xf32> to vector<32x32xf32>
    %200 = arith.mulf %195, %199 : vector<32x32xf32>
    %201 = vector.extract_strided_slice %62 {offsets = [1, 0], sizes = [1, 32], strides = [1, 1]} : vector<2x32xf32> to vector<1x32xf32>
    %cst_42 = arith.constant dense<0.000000e+00> : vector<1x32xf32>
    %202 = tpu.matmul %201, %200, %cst_42 {dimension_numbers = #tpu.dot_dimension_numbers<[1], [1], [0], [0], [0, 0, 1, 0], [], []>} : vector<1x32xf32>, vector<32x32xf32>, vector<1x32xf32> -> vector<1x32xf32>
    %203 = arith.addf %176, %202 : vector<1x32xf32>
    %204 = vector.extract_strided_slice %34 {offsets = [1, 0], sizes = [1, 32], strides = [1, 1]} : vector<2x32xf32> to vector<1x32xf32>
    %205 = vector.extract_strided_slice %35 {offsets = [1, 0], sizes = [1, 32], strides = [1, 1]} : vector<2x32xf32> to vector<1x32xf32>
    %206 = vector.extract_strided_slice %36 {offsets = [1, 0], sizes = [1, 32], strides = [1, 1]} : vector<2x32xf32> to vector<1x32xf32>
    %207 = vector.extract_strided_slice %37 {offsets = [1, 0], sizes = [1, 32], strides = [1, 1]} : vector<2x32xf32> to vector<1x32xf32>
    %208 = tpu.concatenate %204, %205, %206, %207 in 0 : vector<1x32xf32>, vector<1x32xf32>, vector<1x32xf32>, vector<1x32xf32> -> vector<4x32xf32>
    %209 = vector.extract_strided_slice %50 {offsets = [1, 0], sizes = [1, 32], strides = [1, 1]} : vector<2x32xf32> to vector<1x32xf32>
    %210 = vector.extract_strided_slice %51 {offsets = [1, 0], sizes = [1, 32], strides = [1, 1]} : vector<2x32xf32> to vector<1x32xf32>
    %211 = vector.extract_strided_slice %52 {offsets = [1, 0], sizes = [1, 32], strides = [1, 1]} : vector<2x32xf32> to vector<1x32xf32>
    %212 = vector.extract_strided_slice %53 {offsets = [1, 0], sizes = [1, 32], strides = [1, 1]} : vector<2x32xf32> to vector<1x32xf32>
    %213 = tpu.concatenate %209, %210, %211, %212 in 0 : vector<1x32xf32>, vector<1x32xf32>, vector<1x32xf32>, vector<1x32xf32> -> vector<4x32xf32>
    %cst_43 = arith.constant dense<0.000000e+00> : vector<32x32xf32>
    %214 = tpu.matmul %208, %213, %cst_43 {dimension_numbers = #tpu.dot_dimension_numbers<[0], [0], [1], [1], [0, 1, 1, 1], [], []>} : vector<4x32xf32>, vector<4x32xf32>, vector<32x32xf32> -> vector<32x32xf32>
    %cst_44 = arith.constant 5.000000e-01 : f32
    %215 = vector.broadcast %cst_44 : f32 to vector<32x32xf32>
    %216 = arith.mulf %214, %215 : vector<32x32xf32>
    %217 = arith.addf %216, %66 : vector<32x32xf32>
    %cst_45 = arith.constant dense<0xFF800000> : vector<32xf32>
    %218 = vector.multi_reduction <maximumf>, %217, %cst_45 [1] : vector<32x32xf32> to vector<32xf32>
    %219 = vector.shape_cast %218 : vector<32xf32> to vector<32x1xf32>
    %220 = vector.broadcast %219 : vector<32x1xf32> to vector<32x32xf32>
    %221 = arith.subf %217, %220 : vector<32x32xf32>
    %222 = math.exp %221 : vector<32x32xf32>
    %cst_46 = arith.constant dense<0.000000e+00> : vector<32xf32>
    %223 = vector.multi_reduction <add>, %222, %cst_46 [1] : vector<32x32xf32> to vector<32xf32>
    %224 = vector.shape_cast %223 : vector<32xf32> to vector<32x1xf32>
    %225 = tpu.reciprocal %224 {approx = true} : vector<32x1xf32> -> vector<32x1xf32>
    %226 = vector.broadcast %225 : vector<32x1xf32> to vector<32x32xf32>
    %227 = arith.mulf %222, %226 : vector<32x32xf32>
    %228 = vector.extract_strided_slice %63 {offsets = [1, 0], sizes = [1, 32], strides = [1, 1]} : vector<2x32xf32> to vector<1x32xf32>
    %cst_47 = arith.constant dense<0.000000e+00> : vector<1x32xf32>
    %229 = tpu.matmul %228, %227, %cst_47 {dimension_numbers = #tpu.dot_dimension_numbers<[1], [1], [0], [0], [0, 0, 1, 0], [], []>} : vector<1x32xf32>, vector<32x32xf32>, vector<1x32xf32> -> vector<1x32xf32>
    %230 = arith.addf %203, %229 : vector<1x32xf32>
    %231 = vector.extract_strided_slice %38 {offsets = [1, 0], sizes = [1, 32], strides = [1, 1]} : vector<2x32xf32> to vector<1x32xf32>
    %232 = vector.extract_strided_slice %39 {offsets = [1, 0], sizes = [1, 32], strides = [1, 1]} : vector<2x32xf32> to vector<1x32xf32>
    %233 = vector.extract_strided_slice %40 {offsets = [1, 0], sizes = [1, 32], strides = [1, 1]} : vector<2x32xf32> to vector<1x32xf32>
    %234 = vector.extract_strided_slice %41 {offsets = [1, 0], sizes = [1, 32], strides = [1, 1]} : vector<2x32xf32> to vector<1x32xf32>
    %235 = tpu.concatenate %231, %232, %233, %234 in 0 : vector<1x32xf32>, vector<1x32xf32>, vector<1x32xf32>, vector<1x32xf32> -> vector<4x32xf32>
    %236 = vector.extract_strided_slice %54 {offsets = [1, 0], sizes = [1, 32], strides = [1, 1]} : vector<2x32xf32> to vector<1x32xf32>
    %237 = vector.extract_strided_slice %55 {offsets = [1, 0], sizes = [1, 32], strides = [1, 1]} : vector<2x32xf32> to vector<1x32xf32>
    %238 = vector.extract_strided_slice %56 {offsets = [1, 0], sizes = [1, 32], strides = [1, 1]} : vector<2x32xf32> to vector<1x32xf32>
    %239 = vector.extract_strided_slice %57 {offsets = [1, 0], sizes = [1, 32], strides = [1, 1]} : vector<2x32xf32> to vector<1x32xf32>
    %240 = tpu.concatenate %236, %237, %238, %239 in 0 : vector<1x32xf32>, vector<1x32xf32>, vector<1x32xf32>, vector<1x32xf32> -> vector<4x32xf32>
    %cst_48 = arith.constant dense<0.000000e+00> : vector<32x32xf32>
    %241 = tpu.matmul %235, %240, %cst_48 {dimension_numbers = #tpu.dot_dimension_numbers<[0], [0], [1], [1], [0, 1, 1, 1], [], []>} : vector<4x32xf32>, vector<4x32xf32>, vector<32x32xf32> -> vector<32x32xf32>
    %cst_49 = arith.constant 5.000000e-01 : f32
    %242 = vector.broadcast %cst_49 : f32 to vector<32x32xf32>
    %243 = arith.mulf %241, %242 : vector<32x32xf32>
    %244 = arith.addf %243, %66 : vector<32x32xf32>
    %cst_50 = arith.constant dense<0xFF800000> : vector<32xf32>
    %245 = vector.multi_reduction <maximumf>, %244, %cst_50 [1] : vector<32x32xf32> to vector<32xf32>
    %246 = vector.shape_cast %245 : vector<32xf32> to vector<32x1xf32>
    %247 = vector.broadcast %246 : vector<32x1xf32> to vector<32x32xf32>
    %248 = arith.subf %244, %247 : vector<32x32xf32>
    %249 = math.exp %248 : vector<32x32xf32>
    %cst_51 = arith.constant dense<0.000000e+00> : vector<32xf32>
    %250 = vector.multi_reduction <add>, %249, %cst_51 [1] : vector<32x32xf32> to vector<32xf32>
    %251 = vector.shape_cast %250 : vector<32xf32> to vector<32x1xf32>
    %252 = tpu.reciprocal %251 {approx = true} : vector<32x1xf32> -> vector<32x1xf32>
    %253 = vector.broadcast %252 : vector<32x1xf32> to vector<32x32xf32>
    %254 = arith.mulf %249, %253 : vector<32x32xf32>
    %255 = vector.extract_strided_slice %64 {offsets = [1, 0], sizes = [1, 32], strides = [1, 1]} : vector<2x32xf32> to vector<1x32xf32>
    %cst_52 = arith.constant dense<0.000000e+00> : vector<1x32xf32>
    %256 = tpu.matmul %255, %254, %cst_52 {dimension_numbers = #tpu.dot_dimension_numbers<[1], [1], [0], [0], [0, 0, 1, 0], [], []>} : vector<1x32xf32>, vector<32x32xf32>, vector<1x32xf32> -> vector<1x32xf32>
    %257 = arith.addf %230, %256 : vector<1x32xf32>
    %258 = vector.extract_strided_slice %42 {offsets = [1, 0], sizes = [1, 32], strides = [1, 1]} : vector<2x32xf32> to vector<1x32xf32>
    %259 = vector.extract_strided_slice %43 {offsets = [1, 0], sizes = [1, 32], strides = [1, 1]} : vector<2x32xf32> to vector<1x32xf32>
    %260 = vector.extract_strided_slice %44 {offsets = [1, 0], sizes = [1, 32], strides = [1, 1]} : vector<2x32xf32> to vector<1x32xf32>
    %261 = vector.extract_strided_slice %45 {offsets = [1, 0], sizes = [1, 32], strides = [1, 1]} : vector<2x32xf32> to vector<1x32xf32>
    %262 = tpu.concatenate %258, %259, %260, %261 in 0 : vector<1x32xf32>, vector<1x32xf32>, vector<1x32xf32>, vector<1x32xf32> -> vector<4x32xf32>
    %263 = vector.extract_strided_slice %58 {offsets = [1, 0], sizes = [1, 32], strides = [1, 1]} : vector<2x32xf32> to vector<1x32xf32>
    %264 = vector.extract_strided_slice %59 {offsets = [1, 0], sizes = [1, 32], strides = [1, 1]} : vector<2x32xf32> to vector<1x32xf32>
    %265 = vector.extract_strided_slice %60 {offsets = [1, 0], sizes = [1, 32], strides = [1, 1]} : vector<2x32xf32> to vector<1x32xf32>
    %266 = vector.extract_strided_slice %61 {offsets = [1, 0], sizes = [1, 32], strides = [1, 1]} : vector<2x32xf32> to vector<1x32xf32>
    %267 = tpu.concatenate %263, %264, %265, %266 in 0 : vector<1x32xf32>, vector<1x32xf32>, vector<1x32xf32>, vector<1x32xf32> -> vector<4x32xf32>
    %cst_53 = arith.constant dense<0.000000e+00> : vector<32x32xf32>
    %268 = tpu.matmul %262, %267, %cst_53 {dimension_numbers = #tpu.dot_dimension_numbers<[0], [0], [1], [1], [0, 1, 1, 1], [], []>} : vector<4x32xf32>, vector<4x32xf32>, vector<32x32xf32> -> vector<32x32xf32>
    %cst_54 = arith.constant 5.000000e-01 : f32
    %269 = vector.broadcast %cst_54 : f32 to vector<32x32xf32>
    %270 = arith.mulf %268, %269 : vector<32x32xf32>
    %271 = arith.addf %270, %66 : vector<32x32xf32>
    %cst_55 = arith.constant dense<0xFF800000> : vector<32xf32>
    %272 = vector.multi_reduction <maximumf>, %271, %cst_55 [1] : vector<32x32xf32> to vector<32xf32>
    %273 = vector.shape_cast %272 : vector<32xf32> to vector<32x1xf32>
    %274 = vector.broadcast %273 : vector<32x1xf32> to vector<32x32xf32>
    %275 = arith.subf %271, %274 : vector<32x32xf32>
    %276 = math.exp %275 : vector<32x32xf32>
    %cst_56 = arith.constant dense<0.000000e+00> : vector<32xf32>
    %277 = vector.multi_reduction <add>, %276, %cst_56 [1] : vector<32x32xf32> to vector<32xf32>
    %278 = vector.shape_cast %277 : vector<32xf32> to vector<32x1xf32>
    %279 = tpu.reciprocal %278 {approx = true} : vector<32x1xf32> -> vector<32x1xf32>
    %280 = vector.broadcast %279 : vector<32x1xf32> to vector<32x32xf32>
    %281 = arith.mulf %276, %280 : vector<32x32xf32>
    %282 = vector.extract_strided_slice %65 {offsets = [1, 0], sizes = [1, 32], strides = [1, 1]} : vector<2x32xf32> to vector<1x32xf32>
    %cst_57 = arith.constant dense<0.000000e+00> : vector<1x32xf32>
    %283 = tpu.matmul %282, %281, %cst_57 {dimension_numbers = #tpu.dot_dimension_numbers<[1], [1], [0], [0], [0, 0, 1, 0], [], []>} : vector<1x32xf32>, vector<32x32xf32>, vector<1x32xf32> -> vector<1x32xf32>
    %284 = arith.addf %257, %283 : vector<1x32xf32>
    %285 = tpu.concatenate %175, %284 in 0 : vector<1x32xf32>, vector<1x32xf32> -> vector<2x32xf32>
    %c0_58 = arith.constant 0 : index
    %c0_59 = arith.constant 0 : index
    %286 = memref.load %arg6[%c0_58, %c0_59] : memref<1x1xf32, #tpu.memory_space<smem>>
    %287 = vector.broadcast %286 : f32 to vector<2x32xf32>
    %288 = arith.addf %285, %287 : vector<2x32xf32>
    %289 = arith.addf %24, %288 : vector<2x32xf32>
    %c0_60 = arith.constant 0 : index
    %c0_61 = arith.constant 0 : index
    %290 = vector.load %arg7[%c0_60, %c0_61] : memref<1x32xf32, #tpu.memory_space<vmem>>, vector<1x32xf32>
    %c0_62 = arith.constant 0 : index
    %c0_63 = arith.constant 0 : index
    %291 = vector.load %arg8[%c0_62, %c0_63] : memref<1x32xf32, #tpu.memory_space<vmem>>, vector<1x32xf32>
    %cst_64 = arith.constant dense<0.000000e+00> : vector<2xf32>
    %292 = vector.multi_reduction <add>, %289, %cst_64 [1] : vector<2x32xf32> to vector<2xf32>
    %293 = vector.shape_cast %292 : vector<2xf32> to vector<2x1xf32>
    %cst_65 = arith.constant 3.200000e+01 : f32
    %294 = vector.broadcast %cst_65 : f32 to vector<2x1xf32>
    %295 = arith.divf %293, %294 : vector<2x1xf32>
    %296 = vector.broadcast %295 : vector<2x1xf32> to vector<2x32xf32>
    %297 = arith.subf %289, %296 : vector<2x32xf32>
    %298 = arith.mulf %297, %297 : vector<2x32xf32>
    %cst_66 = arith.constant dense<0.000000e+00> : vector<2xf32>
    %299 = vector.multi_reduction <add>, %298, %cst_66 [1] : vector<2x32xf32> to vector<2xf32>
    %300 = vector.shape_cast %299 : vector<2xf32> to vector<2x1xf32>
    %cst_67 = arith.constant 3.200000e+01 : f32
    %301 = vector.broadcast %cst_67 : f32 to vector<2x1xf32>
    %302 = arith.divf %300, %301 : vector<2x1xf32>
    %303 = vector.broadcast %295 : vector<2x1xf32> to vector<2x32xf32>
    %304 = arith.subf %289, %303 : vector<2x32xf32>
    %cst_68 = arith.constant 9.99999974E-6 : f32
    %305 = vector.broadcast %cst_68 : f32 to vector<2x1xf32>
    %306 = arith.addf %302, %305 : vector<2x1xf32>
    %307 = math.rsqrt %306 : vector<2x1xf32>
    %308 = vector.broadcast %307 : vector<2x1xf32> to vector<2x32xf32>
    %309 = arith.mulf %304, %308 : vector<2x32xf32>
    %310 = vector.broadcast %290 : vector<1x32xf32> to vector<2x32xf32>
    %311 = arith.mulf %309, %310 : vector<2x32xf32>
    %312 = vector.broadcast %291 : vector<1x32xf32> to vector<2x32xf32>
    %313 = arith.addf %311, %312 : vector<2x32xf32>
    %c0_69 = arith.constant 0 : index
    %c0_70 = arith.constant 0 : index
    %314 = vector.load %arg9[%c0_69, %c0_70] : memref<32x128xf32, #tpu.memory_space<vmem>>, vector<32x128xf32>
    %cst_71 = arith.constant dense<0.000000e+00> : vector<2x128xf32>
    %315 = tpu.matmul %313, %314, %cst_71 {dimension_numbers = #tpu.dot_dimension_numbers<[1], [0], [0], [1], [0, 0, 1, 1], [], []>} : vector<2x32xf32>, vector<32x128xf32>, vector<2x128xf32> -> vector<2x128xf32>
    %c0_72 = arith.constant 0 : index
    %c0_73 = arith.constant 0 : index
    %316 = vector.load %arg10[%c0_72, %c0_73] : memref<1x128xf32, #tpu.memory_space<vmem>>, vector<1x128xf32>
    %317 = vector.broadcast %316 : vector<1x128xf32> to vector<2x128xf32>
    %318 = arith.addf %315, %317 : vector<2x128xf32>
    %cst_74 = arith.constant 0.000000e+00 : f32
    %319 = vector.broadcast %cst_74 : f32 to vector<2x128xf32>
    %320 = arith.maximumf %318, %319 : vector<2x128xf32>
    %c0_75 = arith.constant 0 : index
    %c0_76 = arith.constant 0 : index
    %321 = vector.load %arg11[%c0_75, %c0_76] : memref<128x32xf32, #tpu.memory_space<vmem>>, vector<128x32xf32>
    %cst_77 = arith.constant dense<0.000000e+00> : vector<2x32xf32>
    %322 = tpu.matmul %320, %321, %cst_77 {dimension_numbers = #tpu.dot_dimension_numbers<[1], [0], [0], [1], [0, 0, 1, 1], [], []>} : vector<2x128xf32>, vector<128x32xf32>, vector<2x32xf32> -> vector<2x32xf32>
    %c0_78 = arith.constant 0 : index
    %c0_79 = arith.constant 0 : index
    %323 = vector.load %arg12[%c0_78, %c0_79] : memref<1x32xf32, #tpu.memory_space<vmem>>, vector<1x32xf32>
    %324 = vector.broadcast %323 : vector<1x32xf32> to vector<2x32xf32>
    %325 = arith.addf %322, %324 : vector<2x32xf32>
    %326 = arith.addf %313, %325 : vector<2x32xf32>
    %c0_80 = arith.constant 0 : index
    %c0_81 = arith.constant 0 : index
    %327 = vector.load %arg13[%c0_80, %c0_81] : memref<1x32xf32, #tpu.memory_space<vmem>>, vector<1x32xf32>
    %cst_82 = arith.constant dense<0.000000e+00> : vector<1x2xf32>
    %328 = tpu.matmul %327, %326, %cst_82 {dimension_numbers = #tpu.dot_dimension_numbers<[1], [1], [0], [0], [0, 0, 1, 0], [], []>} : vector<1x32xf32>, vector<2x32xf32>, vector<1x2xf32> -> vector<1x2xf32>
    %c0_83 = arith.constant 0 : index
    %c0_84 = arith.constant 0 : index
    %329 = memref.load %arg14[%c0_83, %c0_84] : memref<1x1xf32, #tpu.memory_space<smem>>
    %330 = vector.broadcast %329 : f32 to vector<1x2xf32>
    %331 = arith.addf %328, %330 : vector<1x2xf32>
    %c0_85 = arith.constant 0 : index
    %c0_86 = arith.constant 0 : index
    %332 = vector.load %arg15[%c0_85, %c0_86] : memref<1x2xf32, #tpu.memory_space<vmem>>, vector<1x2xf32>
    tpu.vector_store %arg15[%c0_85, %c0_86], %331 {strides = array<i32>} : memref<1x2xf32, #tpu.memory_space<vmem>>, vector<1x2xf32>,
    return
  }
}

</mosaic_0001>

<bundles_post_ra>
// kernel: tpu_custom_call.1
= control target key start
LH: loop header
LB: loop body
LE: loop exit
PB: predicated region body
PF: predicated region fallthrough
CT: control target
= control target key end

     0   :  { %22 = vsyncpa [#allocation5], 0  ;;  %s6226_s0 = inlined_call_operand.vmem [shape: f32[2,32], index: 0, kind: input, shape index: {}]   ;;  %s6227_s1 = inlined_call_operand.vmem [shape: f32[32,32], index: 1, kind: input, shape index: {}]   ;;  %s6228_s2 = inlined_call_operand.vmem [shape: f32[1,32], index: 2, kind: input, shape index: {}]   ;;  %s6229_s3 = inlined_call_operand.vmem [shape: f32[1,32], index: 3, kind: input, shape index: {}]   ;;  %s6230_s4 = inlined_call_operand.hbm [shape: f32[32,4608], index: 4, kind: input, shape index: {}]   ;;  %s6231_s5 = inlined_call_operand.vmem [shape: f32[1,4608], index: 5, kind: input, shape index: {}]   ;;  %s6232_s6 = inlined_call_operand.<no memory space> [shape: f32[1,1], index: 6, kind: input, shape index: {}]   ;;  %s6233_s7 = inlined_call_operand.vmem [shape: f32[1,32], index: 7, kind: input, shape index: {}]   ;;  %s6234_s8 = inlined_call_operand.vmem [shape: f32[1,32], index: 8, kind: input, shape index: {}]   ;;  %s6235_s9 = inlined_call_operand.vmem [shape: f32[32,128], index: 9, kind: input, shape index: {}]   ;;  %s6236_s10 = inlined_call_operand.vmem [shape: f32[1,128], index: 10, kind: input, shape index: {}]   ;;  %s6237_s11 = inlined_call_operand.vmem [shape: f32[128,32], index: 11, kind: input, shape index: {}]   ;;  %s6238_s12 = inlined_call_operand.vmem [shape: f32[1,32], index: 12, kind: input, shape index: {}]   ;;  %s6239_s13 = inlined_call_operand.vmem [shape: f32[1,32], index: 13, kind: input, shape index: {}]   ;;  %s6240_s14 = inlined_call_operand.<no memory space> [shape: f32[1,1], index: 14, kind: input, shape index: {}]   ;;  %s6241_s15 = inlined_call_operand.hbm [shape: f32[1,2], index: 15, kind: output, shape index: {}]  }
   0x1   :  { %23 = vsyncpa [#allocation6], 0  ;;  %s5219_s18 = smov [#allocation4]   ;;  %s5171_s22 = scalar_lea.hbm %s6230_s4, 18432 }
   0x2   :  { %s37_s19 = sshll.u32 %s5219_s18, 4  ;;  %p5172_p0 = scmp.ne.s32.totalorder %s6230_s4, %s5171_s22  ;;  %s38_s19 = int_to_ptr.vmem [resolvable:$true] %s37_s19 }
   0x3   :  { %p5175_p1 = scmp.lt.u32.totalorder %s5171_s22, %s6230_s4 }
   0x5   :  { %p5177_p2 = pnand %p5175_p1, %p5172_p0 }
   0x7   :  { %5180 = shalt.err (!%p5177_p2)
}
   0x8   :  { %s5181_s27 = scalar_lea.vmem %s38_s19, 18432  ;;  %p5186_p4 = scmp.lt.s32.totalorder %s38_s19, %s38_s19 }
   0x9   :  { %p5182_p3 = scmp.ne.s32.totalorder %s38_s19, %s5181_s27  ;;  %p5187_p5 = scmp.lt.s32.totalorder %s5181_s27, %s5181_s27 }
   0xb   :  { %p5188_p6 = por %p5187_p5, %p5186_p4 }
   0xd   :  { %p5189_p7 = pnand %p5188_p6, %p5182_p3 }
   0xf   :  { %5192 = shalt.err (!%p5189_p7)
}
  0x10   :  { %s5220_s28 = smov 4608   ;;  %s5221_s29 = smov 288  }
  0x11   :  { %43 = dma.hbm_to_vmem [thread:$0]  %s6230_s4, 18432, %s38_s19, [#allocation5], %s5220_s28, %s5220_s28, %s5221_s29  }
  0x12   :  { %5215 = dma.done.wait [#allocation5], 18432  }
  0x13   :  { %5216 = vsyncadd [#allocation5], 4294948864  ;;  %vm70_vm0 = vcmask 254976   ;;  %v67_v0 = vld [vmem:[%s6226_s0] sm:$0x3]  ;;  %v100_v7 = vld [vmem:[#allocation4 + $0x8] sm:$0xff] }
  0x14   :  { %v71_v1 = vsel %vm70_vm0, %v67_v0, 0.0  ;;  %v136_v8 = vld [vmem:[#allocation4 + $0x128] sm:$0xff]  ;;  %v99_v12 = vld [vmem:[#allocation4] sm:$0xff]  ;;  %v102_v31 = vld [vmem:[#allocation4 + $0x18] sm:$0xff]  ;;  %v5222_v37 = vmov 0.0   ;;  %vm433_vm1 = vcmask 261120  }
  0x15   :  { %72 = vadd.xlane.f32.xlu0 %v71_v1  ;;  %v104_v9 = vld [vmem:[#allocation4 + $0x28] sm:$0xff]  ;;  %v4782_v10 = vpack.c.bf16 %v136_v8, %v100_v7  ;;  %v135_v13 = vld [vmem:[#allocation4 + $0x120] sm:$0xff]  ;;  %v138_v32 = vld [vmem:[#allocation4 + $0x138] sm:$0xff]  ;;  %501 = vmatprep.mubr.f32.mxu1 %v5222_v37  ;;  %vm1728_vm2 = vcmask 1040384   ;;  %vm1730_vm3 = vcmask 1041408   ;;  %vm1732_vm4 = vcmask 1042432  }
  0x16   :  { %v140_v11 = vld [vmem:[#allocation4 + $0x148] sm:$0xff]  ;;  %v4784_v15 = vpack.c.bf16 %v135_v13, %v99_v12  ;;  %v103_v16 = vld [vmem:[#allocation4 + $0x20] sm:$0xff]  ;;  %v4790_v34 = vpack.c.bf16 %v138_v32, %v102_v31  ;;  %643 = vmatprep.mubr.f32.mxu0 %v5222_v37  ;;  %v101_v44 = vld [vmem:[#allocation4 + $0x10] sm:$0xff]  ;;  %vm1791_vm5 = vcmask 1043456   ;;  %vm1778_vm6 = vcmask 31744   ;;  %s5225_s20 = smov [#allocation7]  }
  0x17   :  { %v4798_v14 = vpack.c.bf16 %v140_v11, %v104_v9  ;;  %v139_v17 = vld [vmem:[#allocation4 + $0x140] sm:$0xff]  ;;  %4783 = vmatprep.subr.bf16.mxu1 %v4782_v10  ;;  %v172_v19 = vld [vmem:[#allocation4 + $0x248] sm:$0xff]  ;;  %v137_v45 = vld [vmem:[#allocation4 + $0x130] sm:$0xff]  ;;  %vm5224_vm7 = vmmov 0   ;;  %vm4351_vm9 = vcmask 8192  }
  0x18   :  { %v4800_v18 = vpack.c.bf16 %v139_v17, %v103_v16  ;;  %4785 = vmatpush1.bf16.msra.mxu1 %v4784_v15  ;;  %v208_v20 = vld [vmem:[#allocation4 + $0x368] sm:$0xff]  ;;  %v171_v24 = vld [vmem:[#allocation4 + $0x240] sm:$0xff]  ;;  %v174_v49 = vld [vmem:[#allocation4 + $0x258] sm:$0xff]  ;;  %v4792_v54 = vpack.c.bf16 %v137_v45, %v101_v44 }
  0x19   :  { %4799 = vmatprep.subr.bf16.mxu0 %v4798_v14  ;;  %v176_v21 = vld [vmem:[#allocation4 + $0x268] sm:$0xff]  ;;  %v4786_v22 = vpack.c.bf16 %v208_v20, %v172_v19  ;;  %v207_v25 = vld [vmem:[#allocation4 + $0x360] sm:$0xff]  ;;  %v210_v50 = vld [vmem:[#allocation4 + $0x378] sm:$0xff] }
  0x1a   :  { %4801 = vmatpush1.bf16.msra.mxu0 %v4800_v18  ;;  %v212_v23 = vld [vmem:[#allocation4 + $0x388] sm:$0xff]  ;;  %v4788_v27 = vpack.c.bf16 %v207_v25, %v171_v24  ;;  %v175_v28 = vld [vmem:[#allocation4 + $0x260] sm:$0xff]  ;;  %v173_v56 = vld [vmem:[#allocation4 + $0x250] sm:$0xff]  ;;  %v4794_v59 = vpack.c.bf16 %v210_v50, %v174_v49 }
  0x1b   :  { %v4802_v26 = vpack.c.bf16 %v212_v23, %v176_v21  ;;  %v211_v29 = vld [vmem:[#allocation4 + $0x380] sm:$0xff]  ;;  %4787 = vmatprep.subr.bf16.mxu1 %v4786_v22  ;;  %v108_v33 = vld [vmem:[#allocation4 + $0x48] sm:$0xff]  ;;  %v209_v57 = vld [vmem:[#allocation4 + $0x370] sm:$0xff] }
  0x1c   :  { %v4804_v30 = vpack.c.bf16 %v211_v29, %v175_v28  ;;  %4789 = vmatpush1.bf16.msra.mxu1 %v4788_v27  ;;  %v144_v35 = vld [vmem:[#allocation4 + $0x168] sm:$0xff]  ;;  %v4368_v41 = vld [vmem:[%s6228_s2] ss:$0 sm:$0xff]  ;;  %v106_v63 = vld [vmem:[#allocation4 + $0x38] sm:$0xff]  ;;  %s4359_s2 = sshll.u32 %s5225_s20, 4  ;;  %s4360_s2 = int_to_ptr.vmem [resolvable:$true] %s4359_s2 }
  0x1d   :  { %4803 = vmatprep.subr.bf16.mxu0 %v4802_v26  ;;  %v4814_v36 = vpack.c.bf16 %v144_v35, %v108_v33  ;;  %4791 = vmatprep.subr.bf16.mxu1 %v4790_v34  ;;  %v4369_v43 = vld [vmem:[%s6229_s3] ss:$0 sm:$0xff]  ;;  %v180_v51 = vld [vmem:[#allocation4 + $0x288] sm:$0xff]  ;;  %v178_v11 = vld [vmem:[#allocation4 + $0x278] sm:$0xff]  ;;  %p5198_p9 = scmp.lt.s32.totalorder %s4360_s2, %s4360_s2 }
  0x1e   :  { %4805 = vmatpush1.bf16.msra.mxu0 %v4804_v30  ;;  %v107_v47 = vld [vmem:[#allocation4 + $0x40] sm:$0xff]  ;;  %v216_v52 = vld [vmem:[#allocation4 + $0x3a8] sm:$0xff]  ;;  %v214_v12 = vld [vmem:[#allocation4 + $0x398] sm:$0xff] }
  0x1f   :  { %4815 = vmatprep.subr.bf16.mxu0 %v4814_v36  ;;  %v143_v48 = vld [vmem:[#allocation4 + $0x160] sm:$0xff]  ;;  %v4818_v60 = vpack.c.bf16 %v216_v52, %v180_v51  ;;  %v112_v1 = vld [vmem:[#allocation4 + $0x68] sm:$0xff]  ;;  %v177_v17 = vld [vmem:[#allocation4 + $0x270] sm:$0xff]  ;;  %v4810_v19 = vpack.c.bf16 %v214_v12, %v178_v11 }
  0x20   :  { %v4816_v55 = vpack.c.bf16 %v143_v48, %v107_v47  ;;  %v179_v61 = vld [vmem:[#allocation4 + $0x280] sm:$0xff]  ;;  %v184_v13 = vld [vmem:[#allocation4 + $0x2a8] sm:$0xff]  ;;  %v213_v18 = vld [vmem:[#allocation4 + $0x390] sm:$0xff] }
  0x21   :  { %v215_v62 = vld [vmem:[#allocation4 + $0x3a0] sm:$0xff]  ;;  %v220_v14 = vld [vmem:[#allocation4 + $0x3c8] sm:$0xff]  ;;  %v110_v23 = vld [vmem:[#allocation4 + $0x58] sm:$0xff]  ;;  %v4812_v27 = vpack.c.bf16 %v213_v18, %v177_v17 }
  0x22   :  { %v111_v9 = vld [vmem:[#allocation4 + $0x60] sm:$0xff]  ;;  %v4834_v20 = vpack.c.bf16 %v220_v14, %v184_v13  ;;  %v146_v24 = vld [vmem:[#allocation4 + $0x178] sm:$0xff]  ;;  %v116_v25 = vld [vmem:[#allocation4 + $0x88] sm:$0xff] }
  0x23   :  { %v147_v10 = vld [vmem:[#allocation4 + $0x180] sm:$0xff]  ;;  %v152_v26 = vld [vmem:[#allocation4 + $0x1a8] sm:$0xff]  ;;  %v109_v29 = vld [vmem:[#allocation4 + $0x50] sm:$0xff]  ;;  %v4822_v31 = vpack.c.bf16 %v146_v24, %v110_v23 }
  0x24   :  { %v4832_v16 = vpack.c.bf16 %v147_v10, %v111_v9  ;;  %v183_v21 = vld [vmem:[#allocation4 + $0x2a0] sm:$0xff]  ;;  %v145_v30 = vld [vmem:[#allocation4 + $0x170] sm:$0xff]  ;;  %v4846_v32 = vpack.c.bf16 %v152_v26, %v116_v25  ;;  %v182_v35 = vld [vmem:[#allocation4 + $0x298] sm:$0xff] }
  0x25   :  { %v219_v22 = vld [vmem:[#allocation4 + $0x3c0] sm:$0xff]  ;;  %v218_v36 = vld [vmem:[#allocation4 + $0x3b8] sm:$0xff]  ;;  %v120_v50 = vld [vmem:[#allocation4 + $0xa8] sm:$0xff] }
  0x26   :  { %v4836_v28 = vpack.c.bf16 %v219_v22, %v183_v21  ;;  %v115_v33 = vld [vmem:[#allocation4 + $0x80] sm:$0xff]  ;;  %v4826_v44 = vpack.c.bf16 %v218_v36, %v182_v35  ;;  %v114_v48 = vld [vmem:[#allocation4 + $0x78] sm:$0xff]  ;;  %v156_v51 = vld [vmem:[#allocation4 + $0x1c8] sm:$0xff] }
  0x27   :  { %v151_v34 = vld [vmem:[#allocation4 + $0x1a0] sm:$0xff]  ;;  %v150_v49 = vld [vmem:[#allocation4 + $0x198] sm:$0xff]  ;;  %v124_v11 = vld [vmem:[#allocation4 + $0xc8] sm:$0xff] }
  0x28   :  { %v223_v47 = vld [vmem:[#allocation4 + $0x3e0] sm:$0xff]  ;;  %v118_v9 = vld [vmem:[#allocation4 + $0x98] sm:$0xff]  ;;  %v160_v12 = vld [vmem:[#allocation4 + $0x1e8] sm:$0xff] }
  0x29   :  { %v154_v10 = vld [vmem:[#allocation4 + $0x1b8] sm:$0xff]  ;;  %v4878_v18 = vpack.c.bf16 %v160_v12, %v124_v11  ;;  %v196_v23 = vld [vmem:[#allocation4 + $0x308] sm:$0xff]  ;;  %vm5804_vm8 = vmpackc.low %vm433_vm1, %vm433_vm1 }
  0x2a   :  { %v4854_v17 = vpack.c.bf16 %v154_v10, %v118_v9  ;;  %v190_v21 = vld [vmem:[#allocation4 + $0x2d8] sm:$0xff]  ;;  %v232_v24 = vld [vmem:[#allocation4 + $0x428] sm:$0xff] }
  0x2b   :  { %v226_v22 = vld [vmem:[#allocation4 + $0x3f8] sm:$0xff]  ;;  %v128_v35 = vld [vmem:[#allocation4 + $0xe8] sm:$0xff] }
  0x2c   :  { %v164_v36 = vld [vmem:[#allocation4 + $0x208] sm:$0xff] }
  0x2d   :  { %v204_v9 = vld [vmem:[#allocation4 + $0x348] sm:$0xff] }
  0x2e   :  { %v240_v10 = vld [vmem:[#allocation4 + $0x468] sm:$0xff] }
  0xa2   :  { %v73_v2 = vpop.xlane.xlu0 %72 }
  0xa3   :  { %v75_v3 = vmul.f32 0.03125, %v73_v2  ;;  %v148_v2 = vld [vmem:[#allocation4 + $0x188] sm:$0xff] }
  0xa4   :  { %v4830_v8 = vpack.c.bf16 %v148_v2, %v112_v1 }
  0xa5   :  { %v76_v4 = vsub.f32 %v67_v0, %v75_v3  ;;  %v142_v0 = vld [vmem:[#allocation4 + $0x158] sm:$0xff]  ;;  %v4796_v3 = vpack.c.bf16 %v209_v57, %v173_v56  ;;  %v4838_v56 = vpack.c.bf16 %v150_v49, %v114_v48  ;;  %v4862_v57 = vpack.c.bf16 %v156_v51, %v120_v50  ;;  %v200_v48 = vld [vmem:[#allocation4 + $0x328] sm:$0xff] }
  0xa6   :  { %v4806_v7 = vpack.c.bf16 %v142_v0, %v106_v63  ;;  %v192_v63 = vld [vmem:[#allocation4 + $0x2e8] sm:$0xff] }
  0xa7   :  { %v77_v5 = vmul.f32 %v76_v4, %v76_v4  ;;  %v228_v0 = vld [vmem:[#allocation4 + $0x408] sm:$0xff] }
  0xa8   :  { %v236_v49 = vld [vmem:[#allocation4 + $0x448] sm:$0xff] }
  0xa9   :  { %v78_v6 = vsel %vm70_vm0, %v77_v5, 0.0  ;;  %v105_v5 = vld [vmem:[#allocation4 + $0x30] sm:$0xff] }
  0xaa   :  { %79 = vadd.xlane.f32.xlu0 %v78_v6  ;;  %v141_v6 = vld [vmem:[#allocation4 + $0x150] sm:$0xff] }
  0xab   :  { %v4808_v15 = vpack.c.bf16 %v141_v6, %v105_v5  ;;  %v4866_v6 = vpack.c.bf16 %v228_v0, %v192_v63 }
 0x137   :  { %v80_v38 = vpop.xlane.xlu0 %79 }
 0x138   :  { %v81_v39 = vmul.f32 0.03125, %v80_v38  ;;  %v188_v38 = vld [vmem:[#allocation4 + $0x2c8] sm:$0xff] }
 0x13a   :  { %v82_v40 = vadd.f32 1e-05, %v81_v39  ;;  %v224_v39 = vld [vmem:[#allocation4 + $0x3e8] sm:$0xff] }
 0x13b   :  { %v4850_v45 = vpack.c.bf16 %v224_v39, %v188_v38 }
 0x13c   :  { %5039 = vrsqrt.f32 %v82_v40  ;;  %v4824_v40 = vpack.c.bf16 %v145_v30, %v109_v29  ;;  %v4858_v29 = vpack.c.bf16 %v226_v22, %v190_v21  ;;  %v4882_v30 = vpack.c.bf16 %v232_v24, %v196_v23  ;;  %v129_v24 = vld [vmem:[#allocation4 + $0xf0] sm:$0xff] }
 0x146   :  { %v5040_v42 = vpop.eup %5039 }
 0x147   :  { %v84_v46 = vmul.f32 %v5040_v42, %v76_v4  ;;  %v4820_v4 = vpack.c.bf16 %v215_v62, %v179_v61  ;;  %v181_v42 = vld [vmem:[#allocation4 + $0x290] sm:$0xff]  ;;  %v186_v61 = vld [vmem:[#allocation4 + $0x2b8] sm:$0xff] }
 0x148   :  { %v222_v62 = vld [vmem:[#allocation4 + $0x3d8] sm:$0xff] }
 0x149   :  { %v91_v53 = vmul.f32 %v4368_v41, %v84_v46  ;;  %v4848_v41 = vpack.c.bf16 %v151_v34, %v115_v33  ;;  %v187_v46 = vld [vmem:[#allocation4 + $0x2c0] sm:$0xff]  ;;  %v4842_v5 = vpack.c.bf16 %v222_v62, %v186_v61  ;;  %v122_v33 = vld [vmem:[#allocation4 + $0xb8] sm:$0xff]  ;;  %v132_v61 = vld [vmem:[#allocation4 + $0x108] sm:$0xff] }
 0x14a   :  { %v158_v34 = vld [vmem:[#allocation4 + $0x1d8] sm:$0xff]  ;;  %v168_v62 = vld [vmem:[#allocation4 + $0x228] sm:$0xff] }
 0x14b   :  { %v5331_v58 = vadd.f32 %v4369_v43, %v91_v53  ;;  %v217_v43 = vld [vmem:[#allocation4 + $0x3b0] sm:$0xff]  ;;  %v4852_v53 = vpack.c.bf16 %v223_v47, %v187_v46  ;;  %v194_v46 = vld [vmem:[#allocation4 + $0x2f8] sm:$0xff] }
 0x14c   :  { %v4828_v52 = vpack.c.bf16 %v217_v43, %v181_v42  ;;  %v4870_v42 = vpack.c.bf16 %v158_v34, %v122_v33  ;;  %v4894_v43 = vpack.c.bf16 %v164_v36, %v128_v35  ;;  %v230_v47 = vld [vmem:[#allocation4 + $0x418] sm:$0xff]  ;;  %v133_v36 = vld [vmem:[#allocation4 + $0x110] sm:$0xff] }
 0x14d   :  { %4370 = vmatmul.mubr.msk.f32.vlgmr.msra.gmra.mrb[0].mxu1 %vm433_vm1, %v5331_v58  ;;  %4372 = vmatmul.mubr.msk.f32.vlgmr.msra.gmra.mrb[0].mxu0 %vm433_vm1, %v5331_v58  ;;  %v170_v33 = vld [vmem:[#allocation4 + $0x238] sm:$0xff] }
 0x14e   :  { %4793 = vmatpush1.bf16.msra.mxu1 %v4792_v54  ;;  %4817 = vmatpush1.bf16.msra.mxu0 %v4816_v55  ;;  %v113_v54 = vld [vmem:[#allocation4 + $0x70] sm:$0xff] }
 0x14f   :  { %4795 = vmatprep.subr.bf16.mxu1 %v4794_v59  ;;  %4819 = vmatprep.subr.bf16.mxu0 %v4818_v60  ;;  %v149_v55 = vld [vmem:[#allocation4 + $0x190] sm:$0xff]  ;;  %v119_v59 = vld [vmem:[#allocation4 + $0xa0] sm:$0xff] }
 0x150   :  { %572 = vmatprep.mubr.f32.mxu1 %v5222_v37  ;;  %785 = vmatprep.mubr.f32.mxu0 %v5222_v37  ;;  %v155_v60 = vld [vmem:[#allocation4 + $0x1c0] sm:$0xff]  ;;  %v4840_v1 = vpack.c.bf16 %v149_v55, %v113_v54  ;;  %v4874_v54 = vpack.c.bf16 %v230_v47, %v194_v46  ;;  %v4898_v55 = vpack.c.bf16 %v236_v49, %v200_v48  ;;  %v253_v46 = vlaneseq }
 0x151   :  { %v4864_v2 = vpack.c.bf16 %v155_v60, %v119_v59  ;;  %v126_v59 = vld [vmem:[#allocation4 + $0xd8] sm:$0xff] }
 0x152   :  { %4797 = vmatpush1.bf16.msra.mxu1 %v4796_v3  ;;  %4821 = vmatpush1.bf16.msra.mxu0 %v4820_v4  ;;  %v185_v3 = vld [vmem:[#allocation4 + $0x2b0] sm:$0xff]  ;;  %v162_v60 = vld [vmem:[#allocation4 + $0x1f8] sm:$0xff]  ;;  %v254_v47 = vshrl.u32 %v253_v46, 7 }
 0x153   :  { %4807 = vmatprep.subr.bf16.mxu1 %v4806_v7  ;;  %4831 = vmatprep.subr.bf16.mxu0 %v4830_v8  ;;  %v221_v4 = vld [vmem:[#allocation4 + $0x3d0] sm:$0xff]  ;;  %v191_v7 = vld [vmem:[#allocation4 + $0x2e0] sm:$0xff] }
 0x154   :  { %v227_v8 = vld [vmem:[#allocation4 + $0x400] sm:$0xff]  ;;  %v4844_v13 = vpack.c.bf16 %v221_v4, %v185_v3  ;;  %v4886_v3 = vpack.c.bf16 %v162_v60, %v126_v59  ;;  %v4910_v4 = vpack.c.bf16 %v168_v62, %v132_v61  ;;  %v5385_v48 = vsub.s32 4, %v254_v47 }
 0x155   :  { %4371 = vmatmul.mubr.msk.f32.vlgmr.msra.gmra.mrb[2].mxu1 %vm433_vm1, %v5331_v58  ;;  %4374 = vmatmul.mubr.msk.f32.vlgmr.msra.gmra.mrb[2].mxu0 %vm433_vm1, %v5331_v58  ;;  %v4868_v14 = vpack.c.bf16 %v227_v8, %v191_v7  ;;  %v198_v7 = vld [vmem:[#allocation4 + $0x318] sm:$0xff]  ;;  %v5387_v49 = vsub.s32 5, %v254_v47  ;;  %v5411_v59 = vld [vmem:[%s6231_s5] sm:$0xff]  ;;  %v5413_v60 = vsub.s32 1, %v254_v47 }
 0x156   :  { %4809 = vmatpush1.bf16.msra.mxu1 %v4808_v15  ;;  %4833 = vmatpush1.bf16.msra.mxu0 %v4832_v16  ;;  %v117_v15 = vld [vmem:[#allocation4 + $0x90] sm:$0xff]  ;;  %v234_v8 = vld [vmem:[#allocation4 + $0x438] sm:$0xff]  ;;  %v272_v62 = vrot.slane %v5411_v59, %v5385_v48 }
 0x157   :  { %4811 = vmatprep.subr.bf16.mxu1 %v4810_v19  ;;  %4835 = vmatprep.subr.bf16.mxu0 %v4834_v20  ;;  %v153_v16 = vld [vmem:[#allocation4 + $0x1b0] sm:$0xff]  ;;  %v123_v19 = vld [vmem:[#allocation4 + $0xc0] sm:$0xff] }
 0x158   :  { %714 = vmatprep.mubr.f32.mxu1 %v5222_v37  ;;  %927 = vmatprep.mubr.f32.mxu0 %v5222_v37  ;;  %v159_v20 = vld [vmem:[#allocation4 + $0x1e0] sm:$0xff]  ;;  %v4856_v25 = vpack.c.bf16 %v153_v16, %v117_v15  ;;  %v4914_v15 = vpack.c.bf16 %v240_v10, %v204_v9  ;;  %v233_v16 = vld [vmem:[#allocation4 + $0x430] sm:$0xff]  ;;  %v5428_v10 = vld [vmem:[%s6231_s5 + $0x8] sm:$0xff] }
 0x159   :  { %v4880_v26 = vpack.c.bf16 %v159_v20, %v123_v19  ;;  %v130_v19 = vld [vmem:[#allocation4 + $0xf8] sm:$0xff] }
 0x15a   :  { %4813 = vmatpush1.bf16.msra.mxu1 %v4812_v27  ;;  %4837 = vmatpush1.bf16.msra.mxu0 %v4836_v28  ;;  %v189_v27 = vld [vmem:[#allocation4 + $0x2d0] sm:$0xff]  ;;  %v166_v20 = vld [vmem:[#allocation4 + $0x218] sm:$0xff] }
 0x15b   :  { %4823 = vmatprep.subr.bf16.mxu1 %v4822_v31  ;;  %4847 = vmatprep.subr.bf16.mxu0 %v4846_v32  ;;  %v225_v28 = vld [vmem:[#allocation4 + $0x3f0] sm:$0xff]  ;;  %v195_v31 = vld [vmem:[#allocation4 + $0x300] sm:$0xff]  ;;  %v4902_v23 = vpack.c.bf16 %v166_v20, %v130_v19 }
 0x15c   :  { %v231_v32 = vld [vmem:[#allocation4 + $0x420] sm:$0xff]  ;;  %v4860_v38 = vpack.c.bf16 %v225_v28, %v189_v27  ;;  %v238_v27 = vld [vmem:[#allocation4 + $0x458] sm:$0xff] }
 0x15d   :  { %4373 = vmatmul.mubr.msk.f32.vlgmr.msra.gmra.mrb[4].mxu1 %vm433_vm1, %v5331_v58  ;;  %4376 = vmatmul.mubr.msk.f32.vlgmr.msra.gmra.mrb[4].mxu0 %vm433_vm1, %v5331_v58  ;;  %v4884_v39 = vpack.c.bf16 %v231_v32, %v195_v31  ;;  %v237_v31 = vld [vmem:[#allocation4 + $0x450] sm:$0xff]  ;;  %v134_v32 = vld [vmem:[#allocation4 + $0x118] sm:$0xff] }
 0x15e   :  { %4825 = vmatpush1.bf16.msra.mxu1 %v4824_v40  ;;  %4849 = vmatpush1.bf16.msra.mxu0 %v4848_v41  ;;  %v121_v40 = vld [vmem:[#allocation4 + $0xb0] sm:$0xff]  ;;  %v4918_v35 = vpack.c.bf16 %v170_v33, %v134_v32 }
 0x15f   :  { %4827 = vmatprep.subr.bf16.mxu1 %v4826_v44  ;;  %4851 = vmatprep.subr.bf16.mxu0 %v4850_v45  ;;  %v157_v41 = vld [vmem:[#allocation4 + $0x1d0] sm:$0xff]  ;;  %v127_v44 = vld [vmem:[#allocation4 + $0xe0] sm:$0xff] }
 0x160   :  { %856 = vmatprep.mubr.f32.mxu1 %v5222_v37  ;;  %1069 = vmatprep.mubr.f32.mxu0 %v5222_v37  ;;  %v163_v45 = vld [vmem:[#allocation4 + $0x200] sm:$0xff]  ;;  %v4872_v50 = vpack.c.bf16 %v157_v41, %v121_v40  ;;  %v242_v40 = vld [vmem:[#allocation4 + $0x478] sm:$0xff] }
 0x161   :  { %v4896_v51 = vpack.c.bf16 %v163_v45, %v127_v44  ;;  %v241_v44 = vld [vmem:[#allocation4 + $0x470] sm:$0xff] }
 0x162   :  { %4829 = vmatpush1.bf16.msra.mxu1 %v4828_v52  ;;  %4853 = vmatpush1.bf16.msra.mxu0 %v4852_v53  ;;  %v193_v52 = vld [vmem:[#allocation4 + $0x2f0] sm:$0xff] }
 0x163   :  { %4839 = vmatprep.subr.bf16.mxu1 %v4838_v56  ;;  %4863 = vmatprep.subr.bf16.mxu0 %v4862_v57  ;;  %v229_v53 = vld [vmem:[#allocation4 + $0x410] sm:$0xff]  ;;  %v199_v56 = vld [vmem:[#allocation4 + $0x320] sm:$0xff] }
 0x164   :  { %v235_v57 = vld [vmem:[#allocation4 + $0x440] sm:$0xff]  ;;  %v4876_v63 = vpack.c.bf16 %v229_v53, %v193_v52  ;;  %v5398_v53 = vsub.s32 6, %v254_v47 }
 0x165   :  { %4375 = vmatmul.mubr.msk.f32.vlgmr.msra.gmra.mrb[6].mxu1 %vm433_vm1, %v5331_v58  ;;  %4378 = vmatmul.mubr.msk.f32.vlgmr.msra.gmra.mrb[6].mxu0 %vm433_vm1, %v5331_v58  ;;  %v4900_v0 = vpack.c.bf16 %v235_v57, %v199_v56  ;;  %v5406_v57 = vsub.s32 0, %v254_v47 }
 0x166   :  { %4841 = vmatpush1.bf16.msra.mxu1 %v4840_v1  ;;  %4865 = vmatpush1.bf16.msra.mxu0 %v4864_v2  ;;  %v125_v1 = vld [vmem:[#allocation4 + $0xd0] sm:$0xff] }
 0x167   :  { %4843 = vmatprep.subr.bf16.mxu1 %v4842_v5  ;;  %4867 = vmatprep.subr.bf16.mxu0 %v4866_v6  ;;  %v161_v2 = vld [vmem:[#allocation4 + $0x1f0] sm:$0xff]  ;;  %v131_v5 = vld [vmem:[#allocation4 + $0x100] sm:$0xff]  ;;  %v256_v61 = vrot.slane %v5411_v59, %v5406_v57  ;;  %v288_v19 = vrot.slane %v5428_v10, %v5406_v57 }
 0x168   :  { %998 = vmatprep.mubr.f32.mxu1 %v5222_v37  ;;  %1211 = vmatprep.mubr.f32.mxu0 %v5222_v37  ;;  %v167_v6 = vld [vmem:[#allocation4 + $0x220] sm:$0xff]  ;;  %v4888_v11 = vpack.c.bf16 %v161_v2, %v125_v1 }
 0x169   :  { %v4912_v12 = vpack.c.bf16 %v167_v6, %v131_v5 }
 0x16a   :  { %4845 = vmatpush1.bf16.msra.mxu1 %v4844_v13  ;;  %4869 = vmatpush1.bf16.msra.mxu0 %v4868_v14  ;;  %v197_v13 = vld [vmem:[#allocation4 + $0x310] sm:$0xff]  ;;  %v4890_v14 = vpack.c.bf16 %v234_v8, %v198_v7  ;;  %v5423_v7 = vsub.s32 2, %v254_v47 }
 0x16b   :  { %4855 = vmatprep.subr.bf16.mxu1 %v4854_v17  ;;  %4879 = vmatprep.subr.bf16.mxu0 %v4878_v18  ;;  %v203_v17 = vld [vmem:[#allocation4 + $0x340] sm:$0xff]  ;;  %v4892_v21 = vpack.c.bf16 %v233_v16, %v197_v13 }
 0x16c   :  { %v239_v18 = vld [vmem:[#allocation4 + $0x460] sm:$0xff] }
 0x16d   :  { %4377 = vmatmul.mubr.msk.f32.vlgmr.msra.gmra.mrb[8].mxu1 %vm433_vm1, %v5331_v58  ;;  %4380 = vmatmul.mubr.msk.f32.vlgmr.msra.gmra.mrb[8].mxu0 %vm433_vm1, %v5331_v58  ;;  %v4916_v22 = vpack.c.bf16 %v239_v18, %v203_v17  ;;  %v264_v18 = vrot.slane %v5411_v59, %v5423_v7 }
 0x16e   :  { %4857 = vmatpush1.bf16.msra.mxu1 %v4856_v25  ;;  %4881 = vmatpush1.bf16.msra.mxu0 %v4880_v26  ;;  %v165_v25 = vld [vmem:[#allocation4 + $0x210] sm:$0xff]  ;;  %v202_v26 = vld [vmem:[#allocation4 + $0x338] sm:$0xff] }
 0x16f   :  { %4859 = vmatprep.subr.bf16.mxu1 %v4858_v29  ;;  %4883 = vmatprep.subr.bf16.mxu0 %v4882_v30  ;;  %v4904_v28 = vpack.c.bf16 %v165_v25, %v129_v24  ;;  %v4906_v29 = vpack.c.bf16 %v238_v27, %v202_v26  ;;  %v201_v30 = vld [vmem:[#allocation4 + $0x330] sm:$0xff] }
 0x170   :  { %1140 = vmatprep.mubr.f32.mxu1 %v5222_v37  ;;  %1353 = vmatprep.mubr.f32.mxu0 %v5222_v37  ;;  %v4908_v34 = vpack.c.bf16 %v237_v31, %v201_v30 }
 0x172   :  { %4861 = vmatpush1.bf16.msra.mxu1 %v4860_v38  ;;  %4885 = vmatpush1.bf16.msra.mxu0 %v4884_v39  ;;  %v169_v38 = vld [vmem:[#allocation4 + $0x230] sm:$0xff]  ;;  %v206_v39 = vld [vmem:[#allocation4 + $0x358] sm:$0xff] }
 0x173   :  { %4871 = vmatprep.subr.bf16.mxu1 %v4870_v42  ;;  %4895 = vmatprep.subr.bf16.mxu0 %v4894_v43  ;;  %v4920_v41 = vpack.c.bf16 %v169_v38, %v133_v36  ;;  %v4922_v42 = vpack.c.bf16 %v242_v40, %v206_v39  ;;  %v205_v43 = vld [vmem:[#allocation4 + $0x350] sm:$0xff]  ;;  %v304_v40 = vrot.slane %v5428_v10, %v5385_v48 }
 0x174   :  { %v4924_v45 = vpack.c.bf16 %v241_v44, %v205_v43 }
 0x175   :  { %4379 = vmatmul.mubr.msk.f32.vlgmr.msra.gmra.mrb[10].mxu1 %vm433_vm1, %v5331_v58  ;;  %4382 = vmatmul.mubr.msk.f32.vlgmr.msra.gmra.mrb[10].mxu0 %vm433_vm1, %v5331_v58 }
 0x176   :  { %4873 = vmatpush1.bf16.msra.mxu1 %v4872_v50  ;;  %4897 = vmatpush1.bf16.msra.mxu0 %v4896_v51  ;;  %v5392_v50 = vld [vmem:[%s6231_s5 + $0x18] sm:$0xff] }
 0x177   :  { %4875 = vmatprep.subr.bf16.mxu1 %v4874_v54  ;;  %4899 = vmatprep.subr.bf16.mxu0 %v4898_v55  ;;  %v368_v51 = vrot.slane %v5392_v50, %v5385_v48  ;;  %v372_v52 = vrot.slane %v5392_v50, %v5387_v49  ;;  %v5400_v54 = vsub.s32 7, %v254_v47  ;;  %v376_v55 = vrot.slane %v5392_v50, %v5398_v53 }
 0x178   :  { %1282 = vmatprep.mubr.f32.mxu1 %v5222_v37  ;;  %1495 = vmatprep.mubr.f32.mxu0 %v5222_v37 }
 0x179   :  { %v380_v56 = vrot.slane %v5392_v50, %v5400_v54 }
 0x17a   :  { %4877 = vmatpush1.bf16.msra.mxu1 %v4876_v63  ;;  %4901 = vmatpush1.bf16.msra.mxu0 %v4900_v0  ;;  %v260_v63 = vrot.slane %v5411_v59, %v5413_v60  ;;  %v276_v0 = vrot.slane %v5411_v59, %v5387_v49 }
 0x17b   :  { %4887 = vmatprep.subr.bf16.mxu1 %v4886_v3  ;;  %4911 = vmatprep.subr.bf16.mxu0 %v4910_v4 }
 0x17d   :  { %4381 = vmatmul.mubr.msk.f32.vlgmr.msra.gmra.mrb[12].mxu1 %vm433_vm1, %v5331_v58  ;;  %4384 = vmatmul.mubr.msk.f32.vlgmr.msra.gmra.mrb[12].mxu0 %vm433_vm1, %v5331_v58 }
 0x17e   :  { %4889 = vmatpush1.bf16.msra.mxu1 %v4888_v11  ;;  %4913 = vmatpush1.bf16.msra.mxu0 %v4912_v12  ;;  %v5430_v11 = vsub.s32 3, %v254_v47 }
 0x17f   :  { %4891 = vmatprep.subr.bf16.mxu1 %v4890_v14  ;;  %4915 = vmatprep.subr.bf16.mxu0 %v4914_v15 }
 0x180   :  { %1424 = vmatprep.mubr.f32.mxu1 %v5222_v37  ;;  %1637 = vmatprep.mubr.f32.mxu0 %v5222_v37  ;;  %v268_v20 = vrot.slane %v5411_v59, %v5430_v11 }
 0x182   :  { %4893 = vmatpush1.bf16.msra.mxu1 %v4892_v21  ;;  %4917 = vmatpush1.bf16.msra.mxu0 %v4916_v22  ;;  %v292_v21 = vrot.slane %v5428_v10, %v5413_v60 }
 0x183   :  { %4903 = vmatprep.subr.bf16.mxu1 %v4902_v23 }
 0x185   :  { %4383 = vmatmul.mubr.msk.f32.vlgmr.msra.gmra.mrb[14].mxu1 %vm433_vm1, %v5331_v58  ;;  %4386 = vmatmul.mubr.msk.f32.vlgmr.msra.gmra.mrb[14].mxu0 %vm433_vm1, %v5331_v58 }
 0x186   :  { %4905 = vmatpush1.bf16.msra.mxu1 %v4904_v28  ;;  %1566 = vmatprep.mubr.f32.mxu1 %v5222_v37 }
 0x187   :  { %4907 = vmatprep.subr.bf16.mxu1 %v4906_v29 }
 0x18a   :  { %4909 = vmatpush1.bf16.msra.mxu1 %v4908_v34 }
 0x18b   :  { %4919 = vmatprep.subr.bf16.mxu1 %v4918_v35  ;;  %v280_v35 = vrot.slane %v5411_v59, %v5398_v53 }
 0x18d   :  { %4385 = vmatmul.mubr.msk.f32.vlgmr.msra.gmra.mrb[16].mxu1 %vm433_vm1, %v5331_v58 }
 0x18e   :  { %4921 = vmatpush1.bf16.msra.mxu1 %v4920_v41  ;;  %1708 = vmatprep.mubr.f32.mxu1 %v5222_v37  ;;  %v284_v41 = vrot.slane %v5411_v59, %v5400_v54 }
 0x18f   :  { %4923 = vmatprep.subr.bf16.mxu1 %v4922_v42 }
 0x192   :  { %4925 = vmatpush1.bf16.msra.mxu1 %v4924_v45  ;;  %v308_v45 = vrot.slane %v5428_v10, %v5387_v49 }
 0x195   :  { %4387 = vmatmul.mubr.msk.f32.vlgmr.msra.gmra.mrb[18].mxu1 %vm433_vm1, %v5331_v58 }
 0x220   :  { %v503_v1 = vpop.f32.mrb[0].mxu1  ;;  %v645_v2 = vpop.f32.mrb[0].mxu0 }
 0x221   :  { %v504_v3 = vadd.f32 %v503_v1, %v256_v61  ;;  %v646_v4 = vadd.f32 %v645_v2, %v272_v62  ;;  %v505_v5 = vpop.f32.mrb[1].mxu1  ;;  %v647_v6 = vpop.f32.mrb[1].mxu0 }
 0x222   :  { %v506_v8 = vadd.f32 %v505_v5, %v260_v63  ;;  %v648_v9 = vadd.f32 %v647_v6, %v276_v0 }
 0x223   :  { %v2899_v12 = vrot.slane %v504_v3, 1  ;;  %v3103_v13 = vrot.slane %v646_v4, 1 }
 0x224   :  { %v1720_v14 = vrot.slane %v506_v8, 7  ;;  %v1933_v15 = vrot.slane %v648_v9, 7 }
 0x225   :  { %v2905_v16 = vsel %vm1728_vm2, %v2899_v12, %v506_v8  ;;  %v3109_v17 = vsel %vm1728_vm2, %v3103_v13, %v648_v9  ;;  %v296_v12 = vrot.slane %v5428_v10, %v5423_v7 }
 0x226   :  { %v1941_v22 = vsel %vm1728_vm2, %v646_v4, %v1933_v15  ;;  %v1729_v23 = vsel %vm1728_vm2, %v504_v3, %v1720_v14  ;;  %v5465_v3 = vld [vmem:[%s6231_s5 + $0x10] sm:$0xff] }
 0x228   :  { %v574_v24 = vpop.f32.mrb[2].mxu1  ;;  %v787_v25 = vpop.f32.mrb[2].mxu0 }
 0x229   :  { %v575_v26 = vadd.f32 %v574_v24, %v264_v18  ;;  %v788_v27 = vadd.f32 %v787_v25, %v288_v19  ;;  %v576_v28 = vpop.f32.mrb[3].mxu1  ;;  %v789_v29 = vpop.f32.mrb[3].mxu0  ;;  %v300_v19 = vrot.slane %v5428_v10, %v5430_v11  ;;  %v324_v24 = vrot.slane %v5465_v3, %v5413_v60 }
 0x22a   :  { %v577_v30 = vadd.f32 %v576_v28, %v268_v20  ;;  %v790_v31 = vadd.f32 %v789_v29, %v292_v21 }
 0x22b   :  { %v1723_v32 = vrot.slane %v575_v26, 6  ;;  %v2901_v33 = vrot.slane %v575_v26, 7  ;;  %v3477_v34 = vrot.slane %v788_v27, 1 }
 0x22c   :  { %v1726_v36 = vrot.slane %v577_v30, 5  ;;  %v2903_v38 = vrot.slane %v577_v30, 6  ;;  %v2311_v39 = vrot.slane %v790_v31, 7 }
 0x22d   :  { %v1731_v42 = vsel %vm1730_vm3, %v1729_v23, %v1723_v32  ;;  %v2906_v43 = vsel %vm1730_vm3, %v2905_v16, %v2901_v33  ;;  %v3483_v44 = vsel %vm1728_vm2, %v3477_v34, %v790_v31  ;;  %v320_v16 = vrot.slane %v5465_v3, %v5406_v57 }
 0x22e   :  { %v2319_v46 = vsel %vm1728_vm2, %v788_v27, %v2311_v39  ;;  %v5457_v47 = vsel %vm1732_vm4, %v1731_v42, %v1726_v36  ;;  %v5460_v61 = vsel %vm1732_vm4, %v2906_v43, %v2903_v38  ;;  %v312_v36 = vrot.slane %v5428_v10, %v5398_v53 }
 0x230   :  { %v716_v62 = vpop.f32.mrb[4].mxu1  ;;  %v929_v63 = vpop.f32.mrb[4].mxu0 }
 0x231   :  { %v717_v59 = vadd.f32 %v716_v62, %v280_v35  ;;  %v930_v0 = vadd.f32 %v929_v63, %v304_v40  ;;  %v718_v1 = vpop.f32.mrb[5].mxu1  ;;  %v931_v2 = vpop.f32.mrb[5].mxu0 }
 0x232   :  { %v719_v4 = vadd.f32 %v718_v1, %v284_v41  ;;  %v932_v5 = vadd.f32 %v931_v2, %v308_v45  ;;  %v336_v41 = vrot.slane %v5465_v3, %v5385_v48  ;;  %v316_v45 = vrot.slane %v5428_v10, %v5400_v54 }
 0x233   :  { %v1936_v6 = vrot.slane %v717_v59, 6  ;;  %v3105_v8 = vrot.slane %v717_v59, 7  ;;  %v3767_v9 = vrot.slane %v930_v0, 1 }
 0x234   :  { %v1939_v13 = vrot.slane %v719_v4, 5  ;;  %v3107_v14 = vrot.slane %v719_v4, 6  ;;  %v2605_v15 = vrot.slane %v932_v5, 7 }
 0x235   :  { %v1942_v18 = vsel %vm1730_vm3, %v1941_v22, %v1936_v6  ;;  %v3110_v20 = vsel %vm1730_vm3, %v3109_v17, %v3105_v8  ;;  %v3773_v21 = vsel %vm1728_vm2, %v3767_v9, %v932_v5 }
 0x236   :  { %v1943_v23 = vsel %vm1732_vm4, %v1942_v18, %v1939_v13  ;;  %v2613_v25 = vsel %vm1728_vm2, %v930_v0, %v2605_v15  ;;  %v5481_v26 = vsel %vm1732_vm4, %v3110_v20, %v3107_v14  ;;  %v340_v0 = vrot.slane %v5465_v3, %v5387_v49 }
 0x237   :  { %1956 = vxpose.xlu1.b32.start.end [1/1] (short) (narrow) %v1943_v23, 32  ;;  %v328_v14 = vrot.slane %v5465_v3, %v5423_v7  ;;  %v332_v23 = vrot.slane %v5465_v3, %v5430_v11  ;;  %v364_v49 = vrot.slane %v5392_v50, %v5430_v11 }
 0x238   :  { %v858_v27 = vpop.f32.mrb[6].mxu1  ;;  %v1071_v22 = vpop.f32.mrb[6].mxu0 }
 0x239   :  { %v859_v28 = vadd.f32 %v858_v27, %v296_v12  ;;  %v1072_v29 = vadd.f32 %v1071_v22, %v320_v16  ;;  %v860_v30 = vpop.f32.mrb[7].mxu1  ;;  %v1073_v31 = vpop.f32.mrb[7].mxu0 }
 0x23a   :  { %v861_v17 = vadd.f32 %v860_v30, %v300_v19  ;;  %v1074_v32 = vadd.f32 %v1073_v31, %v324_v24  ;;  %v352_v19 = vrot.slane %v5392_v50, %v5406_v57 }
 0x23b   :  { %v2314_v33 = vrot.slane %v859_v28, 6  ;;  %v3479_v34 = vrot.slane %v859_v28, 7  ;;  %v2909_v35 = vrot.slane %v1072_v29, 1  ;;  %v356_v28 = vrot.slane %v5392_v50, %v5413_v60 }
 0x23c   :  { %v2317_v38 = vrot.slane %v861_v17, 5  ;;  %v3481_v39 = vrot.slane %v861_v17, 6  ;;  %v1735_v40 = vrot.slane %v1074_v32, 7 }
 0x23d   :  { %v2915_v42 = vsel %vm1728_vm2, %v2909_v35, %v1074_v32  ;;  %v2320_v43 = vsel %vm1730_vm3, %v2319_v46, %v2314_v33  ;;  %v3484_v62 = vsel %vm1730_vm3, %v3483_v44, %v3479_v34 }
 0x23e   :  { %v1743_v63 = vsel %vm1728_vm2, %v1072_v29, %v1735_v40  ;;  %v2321_v59 = vsel %vm1732_vm4, %v2320_v43, %v2317_v38  ;;  %v5497_v1 = vsel %vm1732_vm4, %v3484_v62, %v3481_v39  ;;  %v344_v62 = vrot.slane %v5465_v3, %v5398_v53 }
 0x23f   :  { %2334 = vxpose.xlu0.b32.start.end [1/1] (short) (narrow) %v2321_v59, 32 }
 0x240   :  { %v1000_v2 = vpop.f32.mrb[8].mxu1  ;;  %v1213_v4 = vpop.f32.mrb[8].mxu0 }
 0x241   :  { %v1001_v5 = vadd.f32 %v1000_v2, %v312_v36  ;;  %v1214_v46 = vadd.f32 %v1213_v4, %v336_v41  ;;  %v1002_v6 = vpop.f32.mrb[9].mxu1  ;;  %v1215_v8 = vpop.f32.mrb[9].mxu0  ;;  %v348_v4 = vrot.slane %v5465_v3, %v5400_v54 }
 0x242   :  { %v1003_v10 = vadd.f32 %v1002_v6, %v316_v45  ;;  %v1216_v9 = vadd.f32 %v1215_v8, %v340_v0 }
 0x243   :  { %v2608_v44 = vrot.slane %v1001_v5, 6  ;;  %v3769_v12 = vrot.slane %v1001_v5, 7  ;;  %v3113_v13 = vrot.slane %v1214_v46, 1 }
 0x244   :  { %v2611_v15 = vrot.slane %v1003_v10, 5  ;;  %v3771_v16 = vrot.slane %v1003_v10, 6  ;;  %v1945_v18 = vrot.slane %v1216_v9, 7  ;;  %1746 = vxpose.xlu1.b32.start.end [1/1] (short) (narrow) %v5457_v47, 32 }
 0x245   :  { %v3119_v20 = vsel %vm1728_vm2, %v3113_v13, %v1216_v9  ;;  %v2614_v24 = vsel %vm1730_vm3, %v2613_v25, %v2608_v44  ;;  %v3774_v27 = vsel %vm1730_vm3, %v3773_v21, %v3769_v12 }
 0x246   :  { %v1953_v22 = vsel %vm1728_vm2, %v1214_v46, %v1945_v18  ;;  %v2615_v29 = vsel %vm1732_vm4, %v2614_v24, %v2611_v15  ;;  %v5514_v47 = vsel %vm1732_vm4, %v3774_v27, %v3771_v16 }
 0x248   :  { %v1142_v30 = vpop.f32.mrb[10].mxu1  ;;  %v1355_v31 = vpop.f32.mrb[10].mxu0 }
 0x249   :  { %v1143_v17 = vadd.f32 %v1142_v30, %v328_v14  ;;  %v1356_v32 = vadd.f32 %v1355_v31, %v352_v19  ;;  %v1144_v33 = vpop.f32.mrb[11].mxu1  ;;  %v1357_v34 = vpop.f32.mrb[11].mxu0  ;;  %v5539_v14 = vld [vmem:[%s6231_s5 + $0x20] sm:$0xf] }
 0x24a   :  { %v1145_v35 = vadd.f32 %v1144_v33, %v332_v23  ;;  %v1358_v25 = vadd.f32 %v1357_v34, %v356_v28  ;;  %v388_v27 = vrot.slane %v5539_v14, %v5413_v60  ;;  %v396_v53 = vrot.slane %v5539_v14, %v5430_v11 }
 0x24b   :  { %v1738_v36 = vrot.slane %v1143_v17, 6  ;;  %v2911_v21 = vrot.slane %v1143_v17, 7  ;;  %v3487_v38 = vrot.slane %v1356_v32, 1 }
 0x24c   :  { %v1741_v39 = vrot.slane %v1145_v35, 5  ;;  %v2913_v40 = vrot.slane %v1145_v35, 6  ;;  %v2323_v41 = vrot.slane %v1358_v25, 7 }
 0x24d   :  { %v3493_v43 = vsel %vm1728_vm2, %v3487_v38, %v1358_v25  ;;  %v1744_v45 = vsel %vm1730_vm3, %v1743_v63, %v1738_v36  ;;  %v2916_v59 = vsel %vm1730_vm3, %v2915_v42, %v2911_v21 }
 0x24e   :  { %v2331_v0 = vsel %vm1728_vm2, %v1356_v32, %v2323_v41  ;;  %v1745_v2 = vsel %vm1732_vm4, %v1744_v45, %v1741_v39  ;;  %v5526_v5 = vsel %vm1732_vm4, %v2916_v59, %v2913_v40 }
 0x24f   :  { %4579 = vmatprep.subr.msk.mxu0 %vm1791_vm5, %v1745_v2 }
 0x250   :  { %v1284_v46 = vpop.f32.mrb[12].mxu1  ;;  %v1497_v6 = vpop.f32.mrb[12].mxu0  ;;  %4580 = vmatpush3.msk.msra.mxu0 %vm1791_vm5, %v1745_v2  ;;  %v392_v2 = vrot.slane %v5539_v14, %v5423_v7 }
 0x251   :  { %v1285_v63 = vadd.f32 %v1284_v46, %v344_v62  ;;  %v1498_v42 = vadd.f32 %v1497_v6, %v368_v51  ;;  %v1286_v8 = vpop.f32.mrb[13].mxu1  ;;  %v1499_v10 = vpop.f32.mrb[13].mxu0  ;;  %2628 = vxpose.xlu1.b32.start.end [1/1] (short) (narrow) %v2615_v29, 32  ;;  %v360_v51 = vrot.slane %v5392_v50, %v5423_v7 }
 0x252   :  { %v1287_v9 = vadd.f32 %v1286_v8, %v348_v4  ;;  %v1500_v3 = vadd.f32 %v1499_v10, %v372_v52 }
 0x253   :  { %v1948_v44 = vrot.slane %v1285_v63, 6  ;;  %v3115_v12 = vrot.slane %v1285_v63, 7  ;;  %v3777_v13 = vrot.slane %v1498_v42, 1 }
 0x254   :  { %v1951_v15 = vrot.slane %v1287_v9, 5  ;;  %v3117_v16 = vrot.slane %v1287_v9, 6  ;;  %v2617_v48 = vrot.slane %v1500_v3, 7 }
 0x255   :  { %v3783_v18 = vsel %vm1728_vm2, %v3777_v13, %v1500_v3  ;;  %v1954_v19 = vsel %vm1730_vm3, %v1953_v22, %v1948_v44  ;;  %v3120_v52 = vsel %vm1730_vm3, %v3119_v20, %v3115_v12 }
 0x256   :  { %v2625_v23 = vsel %vm1728_vm2, %v1498_v42, %v2617_v48  ;;  %v1955_v24 = vsel %vm1732_vm4, %v1954_v19, %v1951_v15  ;;  %v5553_v28 = vsel %vm1732_vm4, %v3120_v52, %v3117_v16  ;;  %v5616_v52 = vld [vmem:[%s6227_s1 + $0x8] sm:$0xff] }
 0x257   :  { %4587 = vmatprep.subr.msk.mxu1 %vm1791_vm5, %v1955_v24 }
 0x258   :  { %v1426_v29 = vpop.f32.mrb[14].mxu1  ;;  %v5556_v30 = vpop.f32.mrb[14].mxu0  ;;  %4588 = vmatpush3.msk.msra.mxu1 %vm1791_vm5, %v1955_v24 }
 0x259   :  { %v1427_v22 = vadd.f32 %v1426_v29, %v360_v51  ;;  %v1428_v31 = vpop.f32.mrb[15].mxu1  ;;  %v1641_v20 = vpop.f32.mrb[15].mxu0 }
 0x25a   :  { %v1429_v17 = vadd.f32 %v1428_v31, %v364_v49  ;;  %v5559_v32 = vadd.f32 %v1641_v20, %v388_v27 }
 0x25b   :  { %v2326_v33 = vrot.slane %v1427_v22, 6  ;;  %v3489_v34 = vrot.slane %v1427_v22, 7 }
 0x25c   :  { %v2329_v35 = vrot.slane %v1429_v17, 5  ;;  %v3491_v60 = vrot.slane %v1429_v17, 6 }
 0x25d   :  { %v2332_v25 = vsel %vm1730_vm3, %v2331_v0, %v2326_v33  ;;  %v3494_v36 = vsel %vm1730_vm3, %v3493_v43, %v3489_v34  ;;  %v5636_v33 = vld [vmem:[%s6227_s1 + $0x18] sm:$0xff] }
 0x25e   :  { %v2333_v21 = vsel %vm1732_vm4, %v2332_v25, %v2329_v35  ;;  %v5565_v38 = vsel %vm1732_vm4, %v3494_v36, %v3491_v60  ;;  %v5641_v25 = vld [vmem:[%s6227_s1 + $0x10] sm:$0xff] }
 0x25f   :  { %4617 = vmatprep.subr.msk.mxu1 %vm1791_vm5, %v2333_v21 }
 0x260   :  { %v1568_v39 = vpop.f32.mrb[16].mxu1 }
 0x261   :  { %v1569_v40 = vadd.f32 %v1568_v39, %v376_v55  ;;  %v1570_v41 = vpop.f32.mrb[17].mxu1 }
 0x262   :  { %v1571_v45 = vadd.f32 %v1570_v41, %v380_v56 }
 0x263   :  { %v2620_v62 = vrot.slane %v1569_v40, 6  ;;  %v3779_v59 = vrot.slane %v1569_v40, 7 }
 0x264   :  { %v2623_v43 = vrot.slane %v1571_v45, 5  ;;  %v3781_v0 = vrot.slane %v1571_v45, 6 }
 0x265   :  { %v2626_v4 = vsel %vm1730_vm3, %v2625_v23, %v2620_v62  ;;  %v3784_v46 = vsel %vm1730_vm3, %v3783_v18, %v3779_v59 }
 0x266   :  { %v2627_v55 = vsel %vm1732_vm4, %v2626_v4, %v2623_v43  ;;  %v5582_v6 = vsel %vm1732_vm4, %v3784_v46, %v3781_v0 }
 0x268   :  { %v1710_v50 = vpop.f32.mrb[18].mxu1 }
 0x269   :  { %v5584_v54 = vadd.f32 %v1710_v50, %v392_v2  ;;  %v1712_v56 = vpop.f32.mrb[19].mxu1 }
 0x26a   :  { %v5586_v63 = vadd.f32 %v1712_v56, %v396_v53 }
 0x2b7   :  { %v1972_v7 = vpop.trf.xlu1 }
 0x2b8   :  { %4589 = vmatprep.mubr.msk.f32.mxu1 %vm1778_vm6, %v1972_v7 }
 0x2bb   :  { %v1973_v42 = vpop.trf.xlu1 }
 0x2bc   :  { %4590 = vmatmul.mubr.msk.f32.vlgmr.msra.gmra.mrb[20].mxu1 %vm1778_vm6, %v1973_v42 }
 0x2bd   :  { %4618 = vmatpush3.msk.msra.mxu1 %vm1791_vm5, %v2333_v21 }
 0x2be   :  { %4636 = vmatprep.subr.msk.mxu1 %vm1791_vm5, %v2627_v55 }
 0x2bf   :  { %v2350_v11 = vpop.trf.xlu0  ;;  %v1974_v8 = vpop.trf.xlu1 }
 0x2c0   :  { %4592 = vmatprep.mubr.msk.f32.mxu1 %vm1778_vm6, %v1974_v8 }
 0x2c3   :  { %v2351_v10 = vpop.trf.xlu0  ;;  %v1975_v9 = vpop.trf.xlu1 }
 0x2c4   :  { %4593 = vmatmul.mubr.msk.f32.gmra.mrb[22].mxu1 %vm1778_vm6, %v1975_v9 }
 0x2c5   :  { %4619 = vmatprep.mubr.msk.f32.mxu1 %vm1778_vm6, %v2350_v11 }
 0x2c7   :  { %v2352_v3 = vpop.trf.xlu0  ;;  %v1762_v44 = vpop.trf.xlu1 }
 0x2c8   :  { %4581 = vmatprep.mubr.msk.f32.mxu0 %vm1778_vm6, %v1762_v44  ;;  %4620 = vmatmul.mubr.msk.f32.vlgmr.msra.gmra.mrb[24].mxu1 %vm1778_vm6, %v2351_v10 }
 0x2c9   :  { %4637 = vmatpush3.msk.msra.mxu1 %vm1791_vm5, %v2627_v55  ;;  %4622 = vmatprep.mubr.msk.f32.mxu1 %vm1778_vm6, %v2352_v3 }
 0x2ca   :  { %4655 = vmatprep.subr.msk.mxu1 %vm1791_vm5, %v5526_v5 }
 0x2cb   :  { %v2353_v12 = vpop.trf.xlu0  ;;  %v1763_v13 = vpop.trf.xlu1 }
 0x2cc   :  { %4582 = vmatmul.mubr.msk.f32.vlgmr.msra.gmra.mrb[16].mxu0 %vm1778_vm6, %v1763_v13  ;;  %4623 = vmatmul.mubr.msk.f32.gmra.mrb[26].mxu1 %vm1778_vm6, %v2353_v12 }
 0x2cf   :  { %v1764_v15 = vpop.trf.xlu1 }
 0x2d0   :  { %4584 = vmatprep.mubr.msk.f32.mxu0 %vm1778_vm6, %v1764_v15 }
 0x2d3   :  { %v1765_v16 = vpop.trf.xlu1 }
 0x2d4   :  { %4585 = vmatmul.mubr.msk.f32.gmra.mrb[18].mxu0 %vm1778_vm6, %v1765_v16 }
 0x2d5   :  { %4603 = vmatprep.mubr.msk.f32.mxu0 %vm5224_vm7, %v5222_v37 }
 0x2d7   :  { %v2644_v48 = vpop.trf.xlu1 }
 0x2d8   :  { %4638 = vmatprep.mubr.msk.f32.mxu1 %vm1778_vm6, %v2644_v48 }
 0x2db   :  { %v2645_v51 = vpop.trf.xlu1 }
 0x2dc   :  { %4639 = vmatmul.mubr.msk.f32.vlgmr.msra.gmra.mrb[28].mxu1 %vm1778_vm6, %v2645_v51 }
 0x2dd   :  { %4656 = vmatpush3.msk.msra.mxu1 %vm1791_vm5, %v5526_v5  ;;  %v5621_v5 = vld [vmem:[%s6227_s1] sm:$0xff] }
 0x2de   :  { %4663 = vmatprep.subr.msk.mxu1 %vm1791_vm5, %v5553_v28 }
 0x2df   :  { %v2646_v18 = vpop.trf.xlu1 }
 0x2e0   :  { %4641 = vmatprep.mubr.msk.f32.mxu1 %vm1778_vm6, %v2646_v18 }
 0x2e3   :  { %v2647_v19 = vpop.trf.xlu1 }
 0x2e4   :  { %4642 = vmatmul.mubr.msk.f32.gmra.mrb[30].mxu1 %vm1778_vm6, %v2647_v19 }
 0x38f   :  { %v4591_v49 = vpop.f32.mrb[20].mxu1 }
 0x390   :  { %v2089_v23 = vmul.f32 0.5, %v4591_v49  ;;  %v2069_v24 = vpop.f32.mrb[21].mxu1 }
 0x391   :  { %v2088_v27 = vmul.f32 0.5, %v2069_v24 }
 0x392   :  { %v5624_v29 = vadd.f32 %v2089_v23, %v5616_v52 }
 0x393   :  { %v5627_v22 = vadd.f32 %v2088_v27, %v5621_v5 }
 0x394   :  { %v2099_v31 = vsel %vm433_vm1, %v5624_v29, -inf }
 0x395   :  { %2100 = vmax.xlane.f32.xlu0 %v2099_v31  ;;  %v2096_v20 = vsel %vm433_vm1, %v5627_v22, -inf }
 0x396   :  { %2097 = vmax.xlane.f32.xlu1 %v2096_v20 }
 0x397   :  { %v4594_v17 = vpop.f32.mrb[22].mxu1 }
 0x398   :  { %v2091_v34 = vmul.f32 0.5, %v4594_v17  ;;  %v2079_v35 = vpop.f32.mrb[23].mxu1 }
 0x399   :  { %v2090_v60 = vmul.f32 0.5, %v2079_v35 }
 0x39a   :  { %v5644_v36 = vadd.f32 %v2091_v34, %v5636_v33 }
 0x39b   :  { %v4621_v21 = vpop.f32.mrb[24].mxu1  ;;  %v5649_v41 = vadd.f32 %v2090_v60, %v5641_v25 }
 0x39c   :  { %v2105_v39 = vsel %vm433_vm1, %v5644_v36, -inf  ;;  %v2447_v40 = vpop.f32.mrb[25].mxu1  ;;  %v2467_v48 = vmul.f32 0.5, %v4621_v21 }
 0x39d   :  { %2106 = vmax.xlane.f32.xlu1 %v2105_v39  ;;  %v2102_v0 = vsel %vm433_vm1, %v5649_v41, -inf  ;;  %v2466_v44 = vmul.f32 0.5, %v2447_v40 }
 0x39e   :  { %v5689_v31 = vadd.f32 %v2467_v48, %v5616_v52 }
 0x39f   :  { %v4583_v45 = vpop.f32.mrb[16].mxu0  ;;  %v4624_v62 = vpop.f32.mrb[26].mxu1  ;;  %v5679_v19 = vadd.f32 %v2466_v44, %v5621_v5 }
 0x3a0   :  { %v1861_v59 = vpop.f32.mrb[17].mxu0  ;;  %v2457_v43 = vpop.f32.mrb[27].mxu1  ;;  %v1881_v2 = vmul.f32 0.5, %v4583_v45  ;;  %v2469_v23 = vmul.f32 0.5, %v4624_v62  ;;  %v2477_v60 = vsel %vm433_vm1, %v5689_v31, -inf }
 0x3a1   :  { %v1880_v4 = vmul.f32 0.5, %v1861_v59  ;;  %v2468_v46 = vmul.f32 0.5, %v2457_v43  ;;  %2103 = vmax.xlane.f32.xlu1 %v2102_v0  ;;  %v2474_v24 = vsel %vm433_vm1, %v5679_v19, -inf }
 0x3a2   :  { %v5664_v7 = vadd.f32 %v1881_v2, %v5616_v52  ;;  %v5694_v21 = vadd.f32 %v2469_v23, %v5636_v33 }
 0x3a3   :  { %v5654_v53 = vadd.f32 %v2468_v46, %v5641_v25  ;;  %v5657_v55 = vadd.f32 %v1880_v4, %v5621_v5 }
 0x3a4   :  { %v1891_v9 = vsel %vm433_vm1, %v5664_v7, -inf  ;;  %v2483_v45 = vsel %vm433_vm1, %v5694_v21, -inf }
 0x3a5   :  { %v2480_v50 = vsel %vm433_vm1, %v5654_v53, -inf  ;;  %v1888_v56 = vsel %vm433_vm1, %v5657_v55, -inf }
 0x3a6   :  { %2481 = vmax.xlane.f32.xlu0 %v2480_v50  ;;  %1889 = vmax.xlane.f32.xlu1 %v1888_v56 }
 0x3a7   :  { %v4586_v42 = vpop.f32.mrb[18].mxu0 }
 0x3a8   :  { %v1871_v11 = vpop.f32.mrb[19].mxu0  ;;  %v1883_v8 = vmul.f32 0.5, %v4586_v42 }
 0x3a9   :  { %v1882_v10 = vmul.f32 0.5, %v1871_v11 }
 0x3aa   :  { %1892 = vmax.xlane.f32.xlu1 %v1891_v9  ;;  %v5674_v13 = vadd.f32 %v1883_v8, %v5636_v33 }
 0x3ab   :  { %v5669_v3 = vadd.f32 %v1882_v10, %v5641_v25 }
 0x3ac   :  { %v1897_v18 = vsel %vm433_vm1, %v5674_v13, -inf }
 0x3ad   :  { %v1894_v12 = vsel %vm433_vm1, %v5669_v3, -inf }
 0x3ae   :  { %1895 = vmax.xlane.f32.xlu1 %v1894_v12 }
 0x3af   :  { %v4640_v15 = vpop.f32.mrb[28].mxu1 }
 0x3b0   :  { %v2741_v16 = vpop.f32.mrb[29].mxu1  ;;  %v2761_v34 = vmul.f32 0.5, %v4640_v15 }
 0x3b1   :  { %v2760_v51 = vmul.f32 0.5, %v2741_v16 }
 0x3b2   :  { %1898 = vmax.xlane.f32.xlu1 %v1897_v18  ;;  %v5704_v59 = vadd.f32 %v2761_v34, %v5616_v52 }
 0x3b3   :  { %v5682_v49 = vadd.f32 %v2760_v51, %v5621_v5 }
 0x3b4   :  { %v2771_v43 = vsel %vm433_vm1, %v5704_v59, -inf }
 0x3b5   :  { %v2768_v27 = vsel %vm433_vm1, %v5682_v49, -inf }
 0x3b6   :  { %2475 = vmax.xlane.f32.xlu1 %v2474_v24  ;;  %2769 = vmax.xlane.f32.xlu0 %v2768_v27 }
 0x3b7   :  { %v4643_v20 = vpop.f32.mrb[30].mxu1 }
 0x3b8   :  { %v2751_v17 = vpop.f32.mrb[31].mxu1  ;;  %v2763_v40 = vmul.f32 0.5, %v4643_v20 }
 0x3b9   :  { %v2762_v35 = vmul.f32 0.5, %v2751_v17 }
 0x3ba   :  { %2478 = vmax.xlane.f32.xlu1 %v2477_v60  ;;  %v5709_v0 = vadd.f32 %v2763_v40, %v5636_v33 }
 0x3bb   :  { %v5697_v39 = vadd.f32 %v2762_v35, %v5641_v25 }
 0x3bc   :  { %v2777_v2 = vsel %vm433_vm1, %v5709_v0, -inf }
 0x3bd   :  { %v2774_v62 = vsel %vm433_vm1, %v5697_v39, -inf }
 0x3be   :  { %2484 = vmax.xlane.f32.xlu1 %v2483_v45  ;;  %2775 = vmax.xlane.f32.xlu0 %v2774_v62 }
 0x3c2   :  { %2772 = vmax.xlane.f32.xlu1 %v2771_v43 }
 0x3c6   :  { %2778 = vmax.xlane.f32.xlu1 %v2777_v2 }
 0x422   :  { %v2101_v4 = vpop.xlane.xlu0 %2100 }
 0x423   :  { %v2109_v46 = vsub.f32 %v5624_v29, %v2101_v4  ;;  %v2098_v50 = vpop.xlane.xlu1 %2097 }
 0x424   :  { %v2108_v56 = vsub.f32 %v5627_v22, %v2098_v50 }
 0x425   :  { %v2114_v42 = vmul.f32 1.442695, %v2109_v46 }
 0x426   :  { %v2112_v11 = vmul.f32 1.442695, %v2108_v56 }
 0x427   :  { %5041 = vpow2.f32 %v2114_v42 }
 0x428   :  { %5043 = vpow2.f32 %v2112_v11 }
 0x42a   :  { %v2107_v8 = vpop.xlane.xlu1 %2106 }
 0x42b   :  { %v2111_v10 = vsub.f32 %v5644_v36, %v2107_v8 }
 0x42d   :  { %v2118_v9 = vmul.f32 1.442695, %v2111_v10 }
 0x42e   :  { %v2104_v44 = vpop.xlane.xlu1 %2103 }
 0x42f   :  { %5045 = vpow2.f32 %v2118_v9  ;;  %v2110_v12 = vsub.f32 %v5649_v41, %v2104_v44 }
 0x431   :  { %v5717_v15 = vpop.eup %5041  ;;  %v2116_v16 = vmul.f32 1.442695, %v2110_v12 }
 0x432   :  { %v5719_v48 = vpop.eup %5043  ;;  %v2123_v29 = vsel %vm433_vm1, %v5717_v15, 0.0 }
 0x433   :  { %5047 = vpow2.f32 %v2116_v16  ;;  %2124 = vadd.xlane.f32.xlu1 %v2123_v29  ;;  %v1890_v22 = vpop.xlane.xlu1 %1889  ;;  %v2120_v51 = vsel %vm433_vm1, %v5719_v48, 0.0  ;;  %v2482_v40 = vpop.xlane.xlu0 %2481 }
 0x434   :  { %v1900_v36 = vsub.f32 %v5657_v55, %v1890_v22  ;;  %2121 = vadd.xlane.f32.xlu0 %v2120_v51  ;;  %v2488_v2 = vsub.f32 %v5654_v53, %v2482_v40 }
 0x436   :  { %v1904_v18 = vmul.f32 1.442695, %v1900_v36  ;;  %v2494_v11 = vmul.f32 1.442695, %v2488_v2 }
 0x437   :  { %v1893_v23 = vpop.xlane.xlu1 %1892 }
 0x438   :  { %v1901_v41 = vsub.f32 %v5664_v7, %v1893_v23  ;;  %5049 = vpow2.f32 %v1904_v18 }
 0x439   :  { %v5727_v24 = vpop.eup %5045 }
 0x43a   :  { %v1906_v27 = vmul.f32 1.442695, %v1901_v41  ;;  %v2129_v20 = vsel %vm433_vm1, %v5727_v24, 0.0 }
 0x43b   :  { %2130 = vadd.xlane.f32.xlu1 %v2129_v20  ;;  %v1896_v17 = vpop.xlane.xlu1 %1895 }
 0x43c   :  { %5051 = vpow2.f32 %v1906_v27  ;;  %v1902_v34 = vsub.f32 %v5669_v3, %v1896_v17  ;;  %v5223_v27 = vmov 0.0|0.0  }
 0x43d   :  { %v5732_v35 = vpop.eup %5047  ;;  %4926 = vmatprep.subr.bf16.mxu0 %v5223_v27 }
 0x43e   :  { %v1908_v55 = vmul.f32 1.442695, %v1902_v34  ;;  %v2126_v60 = vsel %vm433_vm1, %v5732_v35, 0.0 }
 0x43f   :  { %2127 = vadd.xlane.f32.xlu0 %v2126_v60  ;;  %v1899_v7 = vpop.xlane.xlu1 %1898 }
 0x440   :  { %5053 = vpow2.f32 %v1908_v55  ;;  %v1903_v45 = vsub.f32 %v5674_v13, %v1899_v7 }
 0x442   :  { %v1910_v62 = vmul.f32 1.442695, %v1903_v45  ;;  %v5737_v43 = vpop.eup %5049 }
 0x443   :  { %v2476_v4 = vpop.xlane.xlu1 %2475  ;;  %v2770_v3 = vpop.xlane.xlu0 %2769  ;;  %v1912_v50 = vsel %vm433_vm1, %v5737_v43, 0.0 }
 0x444   :  { %5055 = vpow2.f32 %v1910_v62  ;;  %v2486_v46 = vsub.f32 %v5679_v19, %v2476_v4  ;;  %1913 = vadd.xlane.f32.xlu0 %v1912_v50  ;;  %v2780_v13 = vsub.f32 %v5682_v49, %v2770_v3 }
 0x446   :  { %v5743_v56 = vpop.eup %5051  ;;  %v2490_v42 = vmul.f32 1.442695, %v2486_v46  ;;  %v2784_v44 = vmul.f32 1.442695, %v2780_v13 }
 0x447   :  { %v2479_v8 = vpop.xlane.xlu1 %2478  ;;  %v1915_v10 = vsel %vm433_vm1, %v5743_v56, 0.0 }
 0x448   :  { %v2487_v53 = vsub.f32 %v5689_v31, %v2479_v8  ;;  %1916 = vadd.xlane.f32.xlu1 %v1915_v10  ;;  %5057 = vpow2.f32 %v2490_v42 }
 0x449   :  { %5059 = vpow2.f32 %v2494_v11 }
 0x44a   :  { %v5749_v9 = vpop.eup %5053  ;;  %v2492_v19 = vmul.f32 1.442695, %v2487_v53 }
 0x44b   :  { %v2776_v12 = vpop.xlane.xlu0 %2775  ;;  %v2485_v16 = vpop.xlane.xlu1 %2484  ;;  %v1918_v29 = vsel %vm433_vm1, %v5749_v9, 0.0 }
 0x44c   :  { %5061 = vpow2.f32 %v2492_v19  ;;  %v2782_v49 = vsub.f32 %v5697_v39, %v2776_v12  ;;  %v2489_v22 = vsub.f32 %v5694_v21, %v2485_v16  ;;  %1919 = vadd.xlane.f32.xlu0 %v1918_v29 }
 0x44d   :  { %5063 = vpow2.f32 %v2784_v44 }
 0x44e   :  { %v5755_v51 = vpop.eup %5055  ;;  %v2496_v31 = vmul.f32 1.442695, %v2489_v22  ;;  %v2788_v36 = vmul.f32 1.442695, %v2782_v49 }
 0x44f   :  { %v2773_v18 = vpop.xlane.xlu1 %2772  ;;  %v1921_v23 = vsel %vm433_vm1, %v5755_v51, 0.0 }
 0x450   :  { %v2781_v41 = vsub.f32 %v5704_v59, %v2773_v18  ;;  %1922 = vadd.xlane.f32.xlu1 %v1921_v23  ;;  %5065 = vpow2.f32 %v2496_v31 }
 0x451   :  { %5067 = vpow2.f32 %v2788_v36 }
 0x452   :  { %v2786_v39 = vmul.f32 1.442695, %v2781_v41  ;;  %v5761_v20 = vpop.eup %5057 }
 0x453   :  { %v2779_v21 = vpop.xlane.xlu1 %2778  ;;  %v2498_v34 = vsel %vm433_vm1, %v5761_v20, 0.0  ;;  %v5766_v55 = vpop.eup %5059 }
 0x454   :  { %5069 = vpow2.f32 %v2786_v39  ;;  %v2783_v17 = vsub.f32 %v5709_v0, %v2779_v21  ;;  %2499 = vadd.xlane.f32.xlu0 %v2498_v34  ;;  %v2504_v40 = vsel %vm433_vm1, %v5766_v55, 0.0 }
 0x456   :  { %v5768_v59 = vpop.eup %5061  ;;  %v2790_v60 = vmul.f32 1.442695, %v2783_v17 }
 0x457   :  { %v2501_v7 = vsel %vm433_vm1, %v5768_v59, 0.0  ;;  %v5774_v45 = vpop.eup %5063 }
 0x458   :  { %5071 = vpow2.f32 %v2790_v60  ;;  %2502 = vadd.xlane.f32.xlu1 %v2501_v7  ;;  %2505 = vadd.xlane.f32.xlu0 %v2504_v40  ;;  %v2792_v62 = vsel %vm433_vm1, %v5774_v45, 0.0 }
 0x45a   :  { %v5776_v0 = vpop.eup %5065 }
 0x45b   :  { %v2507_v2 = vsel %vm433_vm1, %v5776_v0, 0.0  ;;  %v5782_v4 = vpop.eup %5067 }
 0x45c   :  { %2793 = vadd.xlane.f32.xlu0 %v2792_v62  ;;  %2508 = vadd.xlane.f32.xlu1 %v2507_v2  ;;  %v2798_v50 = vsel %vm433_vm1, %v5782_v4, 0.0  ;;  %v384_v2 = vrot.slane %v5539_v14, %v5406_v57 }
 0x45e   :  { %v5784_v3 = vpop.eup %5069 }
 0x45f   :  { %v2795_v46 = vsel %vm433_vm1, %v5784_v3, 0.0 }
 0x460   :  { %2799 = vadd.xlane.f32.xlu0 %v2798_v50  ;;  %2796 = vadd.xlane.f32.xlu1 %v2795_v46 }
 0x462   :  { %v5790_v42 = vpop.eup %5071 }
 0x463   :  { %v2801_v11 = vsel %vm433_vm1, %v5790_v42, 0.0 }
 0x464   :  { %2802 = vadd.xlane.f32.xlu1 %v2801_v11 }
 0x48d   :  { %2918 = vxpose.xlu0.b32.start.end [1/1] (short) (narrow) %v5460_v61, 32 }
 0x497   :  { %3122 = vxpose.xlu1.b32.start.end [1/1] (short) (narrow) %v5481_v26, 32 }
 0x49a   :  { %3496 = vxpose.xlu0.b32.start.end [1/1] (short) (narrow) %v5497_v1, 32 }
 0x4a4   :  { %3786 = vxpose.xlu1.b32.start.end [1/1] (short) (narrow) %v5514_v47, 32 }
 0x4c0   :  { %v2125_v13 = vpop.xlane.xlu1 %2124 }
 0x4c1   :  { %5073 = vrcp.f32 %v2125_v13  ;;  %v2122_v8 = vpop.xlane.xlu0 %2121  ;;  %v5835_v13 = vadd.f32 %v5556_v30, %v384_v2 }
 0x4c2   :  { %5075 = vrcp.f32 %v2122_v8 }
 0x4c8   :  { %v2131_v10 = vpop.xlane.xlu1 %2130 }
 0x4c9   :  { %5077 = vrcp.f32 %v2131_v10 }
 0x4cb   :  { %v5074_v53 = vpop.eup %5073 }
 0x4cc   :  { %v5076_v19 = vpop.eup %5075  ;;  %v2137_v44 = vmul.f32 %v5074_v53, %v5717_v15  ;;  %v2128_v12 = vpop.xlane.xlu0 %2127 }
 0x4cd   :  { %v2136_v16 = vmul.f32 %v5076_v19, %v5719_v48  ;;  %5079 = vrcp.f32 %v2128_v12 }
 0x4cf   :  { %v4927_v26 = vpack.c.bf16 %v2137_v44, %v2136_v16 }
 0x4d1   :  { %4929 = vmatpush3.bf16.xpose.msk.msra.mxu0 %vm5804_vm8, %v4927_v26  ;;  %v1914_v1 = vpop.xlane.xlu0 %1913 }
 0x4d2   :  { %4930 = vmatprep.subr.bf16.mxu0 %v5223_v27  ;;  %5081 = vrcp.f32 %v1914_v1 }
 0x4d3   :  { %v5078_v47 = vpop.eup %5077 }
 0x4d4   :  { %v2139_v48 = vmul.f32 %v5078_v47, %v5727_v24 }
 0x4d5   :  { %v1917_v15 = vpop.xlane.xlu1 %1916 }
 0x4d6   :  { %5083 = vrcp.f32 %v1917_v15 }
 0x4d7   :  { %v5080_v29 = vpop.eup %5079 }
 0x4d8   :  { %v2138_v49 = vmul.f32 %v5080_v29, %v5732_v35 }
 0x4d9   :  { %v1920_v22 = vpop.xlane.xlu0 %1919 }
 0x4da   :  { %v4931_v31 = vpack.c.bf16 %v2139_v48, %v2138_v49  ;;  %5085 = vrcp.f32 %v1920_v22 }
 0x4dc   :  { %4933 = vmatpush3.bf16.xpose.msk.msra.mxu0 %vm5804_vm8, %v4931_v31  ;;  %v5082_v18 = vpop.eup %5081 }
 0x4dd   :  { %v1923_v36 = vpop.xlane.xlu1 %1922  ;;  %4934 = vmatprep.subr.bf16.mxu0 %v5223_v27  ;;  %v1928_v41 = vmul.f32 %v5082_v18, %v5737_v43 }
 0x4de   :  { %5087 = vrcp.f32 %v1923_v36 }
 0x4e0   :  { %v5084_v23 = vpop.eup %5083 }
 0x4e1   :  { %v1929_v39 = vmul.f32 %v5084_v23, %v5743_v56  ;;  %v2500_v21 = vpop.xlane.xlu0 %2499 }
 0x4e2   :  { %5089 = vrcp.f32 %v2500_v21 }
 0x4e3   :  { %4604 = vmatmul.mubr.msk.f32.vlgmr.msra.gmra.mrb[20].mxu0 %vm433_vm1, %v5559_v32  ;;  %v4935_v24 = vpack.c.bf16 %v1929_v39, %v1928_v41 }
 0x4e4   :  { %4614 = vmatprep.mubr.msk.f32.mxu0 %vm5224_vm7, %v5222_v37  ;;  %v5086_v17 = vpop.eup %5085 }
 0x4e5   :  { %4937 = vmatpush3.bf16.xpose.msk.msra.mxu0 %vm5804_vm8, %v4935_v24  ;;  %v2503_v35 = vpop.xlane.xlu1 %2502  ;;  %v2506_v34 = vpop.xlane.xlu0 %2505  ;;  %v1930_v56 = vmul.f32 %v5086_v17, %v5749_v9 }
 0x4e6   :  { %5091 = vrcp.f32 %v2503_v35  ;;  %4938 = vmatprep.subr.bf16.mxu0 %v5223_v27 }
 0x4e7   :  { %5093 = vrcp.f32 %v2506_v34 }
 0x4e8   :  { %v5088_v43 = vpop.eup %5087 }
 0x4e9   :  { %v1931_v60 = vmul.f32 %v5088_v43, %v5755_v51  ;;  %v2509_v7 = vpop.xlane.xlu1 %2508  ;;  %v2794_v51 = vpop.xlane.xlu0 %2793 }
 0x4ea   :  { %5095 = vrcp.f32 %v2509_v7 }
 0x4eb   :  { %v4939_v40 = vpack.c.bf16 %v1931_v60, %v1930_v56 }
 0x4ec   :  { %v5090_v62 = vpop.eup %5089 }
 0x4ed   :  { %4941 = vmatpush3.bf16.xpose.msk.msra.mxu0 %vm5804_vm8, %v4939_v40  ;;  %v2797_v46 = vpop.xlane.xlu1 %2796  ;;  %v2514_v11 = vmul.f32 %v5090_v62, %v5761_v20 }
 0x4ee   :  { %4942 = vmatprep.subr.bf16.mxu0 %v5223_v27  ;;  %5097 = vrcp.f32 %v2797_v46 }
 0x4ef   :  { %5099 = vrcp.f32 %v2794_v51 }
 0x4f0   :  { %v5092_v50 = vpop.eup %5091 }
 0x4f1   :  { %v2515_v9 = vmul.f32 %v5092_v50, %v5768_v59  ;;  %v5094_v10 = vpop.eup %5093  ;;  %v2803_v30 = vpop.xlane.xlu1 %2802 }
 0x4f2   :  { %v2516_v20 = vmul.f32 %v5094_v10, %v5766_v55  ;;  %v2800_v59 = vpop.xlane.xlu0 %2799  ;;  %5101 = vrcp.f32 %v2803_v30 }
 0x4f3   :  { %v4943_v8 = vpack.c.bf16 %v2515_v9, %v2514_v11  ;;  %5103 = vrcp.f32 %v2800_v59 }
 0x4f4   :  { %4615 = vmatmul.mubr.msk.f32.vlgmr.msra.gmra.mrb[20].mxu0 %vm433_vm1, %v5835_v13  ;;  %v5096_v57 = vpop.eup %5095 }
 0x4f5   :  { %4945 = vmatpush3.bf16.xpose.msk.msra.mxu0 %vm5804_vm8, %v4943_v8  ;;  %4633 = vmatprep.mubr.msk.f32.mxu0 %vm5224_vm7, %v5222_v37  ;;  %v2517_v14 = vmul.f32 %v5096_v57, %v5776_v0 }
 0x4f6   :  { %4946 = vmatprep.subr.bf16.mxu0 %v5223_v27 }
 0x4f7   :  { %v4947_v53 = vpack.c.bf16 %v2517_v14, %v2516_v20 }
 0x4f8   :  { %v5098_v19 = vpop.eup %5097 }
 0x4f9   :  { %v5100_v44 = vpop.eup %5099  ;;  %v2809_v12 = vmul.f32 %v5098_v19, %v5784_v3 }
 0x4fa   :  { %v2808_v16 = vmul.f32 %v5100_v44, %v5774_v45 }
 0x4fc   :  { %v4951_v26 = vpack.c.bf16 %v2809_v12, %v2808_v16  ;;  %v5102_v0 = vpop.eup %5101 }
 0x4fd   :  { %4949 = vmatpush3.bf16.xpose.msk.msra.mxu0 %vm5804_vm8, %v4947_v53  ;;  %v5104_v55 = vpop.eup %5103  ;;  %v2811_v1 = vmul.f32 %v5102_v0, %v5790_v42 }
 0x4fe   :  { %4950 = vmatprep.subr.bf16.mxu0 %v5223_v27  ;;  %v2810_v3 = vmul.f32 %v5104_v55, %v5782_v4 }
 0x500   :  { %v4955_v47 = vpack.c.bf16 %v2811_v1, %v2810_v3 }
 0x504   :  { %4634 = vmatmul.mubr.msk.f32.vlgmr.msra.gmra.mrb[20].mxu0 %vm433_vm1, %v5584_v54 }
 0x505   :  { %4953 = vmatpush3.bf16.xpose.msk.msra.mxu0 %vm5804_vm8, %v4951_v26  ;;  %4652 = vmatprep.mubr.msk.f32.mxu0 %vm5224_vm7, %v5222_v37 }
 0x506   :  { %4954 = vmatprep.subr.bf16.mxu0 %v5223_v27 }
 0x50d   :  { %4957 = vmatpush3.bf16.xpose.msk.msra.mxu0 %vm5804_vm8, %v4955_v47  ;;  %v2934_v45 = vpop.trf.xlu0 }
 0x50e   :  { %4693 = vmatprep.subr.msk.mxu0 %vm1791_vm5, %v5565_v38  ;;  %4657 = vmatprep.mubr.msk.f32.mxu1 %vm1778_vm6, %v2934_v45 }
 0x511   :  { %v2935_v15 = vpop.trf.xlu0 }
 0x512   :  { %4658 = vmatmul.mubr.msk.f32.vlgmr.msra.gmra.mrb[32].mxu1 %vm1778_vm6, %v2935_v15 }
 0x513   :  { %4664 = vmatpush3.msk.msra.mxu1 %vm1791_vm5, %v5553_v28 }
 0x514   :  { %4653 = vmatmul.mubr.msk.f32.vlgmr.msra.gmra.mrb[20].mxu0 %vm433_vm1, %v5586_v63  ;;  %4958 = vmatprep.subr.bf16.mxu1 %v5223_v27 }
 0x515   :  { %4694 = vmatpush3.msk.msra.mxu0 %vm1791_vm5, %v5565_v38  ;;  %v2936_v4 = vpop.trf.xlu0 }
 0x516   :  { %4712 = vmatprep.subr.msk.mxu0 %vm1791_vm5, %v5582_v6  ;;  %4660 = vmatprep.mubr.msk.f32.mxu1 %vm1778_vm6, %v2936_v4 }
 0x517   :  { %v3138_v42 = vpop.trf.xlu1 }
 0x519   :  { %v2937_v29 = vpop.trf.xlu0 }
 0x51a   :  { %4661 = vmatmul.mubr.msk.f32.gmra.mrb[34].mxu1 %vm1778_vm6, %v2937_v29 }
 0x51b   :  { %4665 = vmatprep.mubr.msk.f32.mxu1 %vm1778_vm6, %v3138_v42  ;;  %v3139_v28 = vpop.trf.xlu1 }
 0x51d   :  { %v3512_v48 = vpop.trf.xlu0 }
 0x51e   :  { %4666 = vmatmul.mubr.msk.f32.vlgmr.msra.gmra.mrb[36].mxu1 %vm1778_vm6, %v3139_v28  ;;  %4695 = vmatprep.mubr.msk.f32.mxu0 %vm1778_vm6, %v3512_v48 }
 0x51f   :  { %v3140_v38 = vpop.trf.xlu1 }
 0x520   :  { %4668 = vmatprep.mubr.msk.f32.mxu1 %vm1778_vm6, %v3140_v38 }
 0x521   :  { %v3513_v49 = vpop.trf.xlu0 }
 0x522   :  { %4696 = vmatmul.mubr.msk.f32.vlgmr.msra.gmra.mrb[22].mxu0 %vm1778_vm6, %v3513_v49 }
 0x523   :  { %4713 = vmatpush3.msk.msra.mxu0 %vm1791_vm5, %v5582_v6  ;;  %v3141_v22 = vpop.trf.xlu1 }
 0x524   :  { %4669 = vmatmul.mubr.msk.f32.gmra.mrb[38].mxu1 %vm1778_vm6, %v3141_v22  ;;  %4990 = vmatprep.subr.bf16.mxu0 %v5223_v27 }
 0x525   :  { %v3514_v31 = vpop.trf.xlu0  ;;  %4679 = vmatprep.mubr.msk.f32.mxu1 %vm5224_vm7, %v5222_v37 }
 0x526   :  { %4698 = vmatprep.mubr.msk.f32.mxu0 %vm1778_vm6, %v3514_v31 }
 0x527   :  { %v3802_v36 = vpop.trf.xlu1 }
 0x529   :  { %v3515_v18 = vpop.trf.xlu0 }
 0x52a   :  { %4699 = vmatmul.mubr.msk.f32.gmra.mrb[24].mxu0 %vm1778_vm6, %v3515_v18 }
 0x52b   :  { %v3803_v23 = vpop.trf.xlu1  ;;  %4714 = vmatprep.mubr.msk.f32.mxu0 %vm1778_vm6, %v3802_v36 }
 0x52e   :  { %4715 = vmatmul.mubr.msk.f32.vlgmr.msra.gmra.mrb[26].mxu0 %vm1778_vm6, %v3803_v23 }
 0x52f   :  { %v3804_v6 = vpop.trf.xlu1 }
 0x530   :  { %4717 = vmatprep.mubr.msk.f32.mxu0 %vm1778_vm6, %v3804_v6 }
 0x533   :  { %v3805_v41 = vpop.trf.xlu1 }
 0x534   :  { %4718 = vmatmul.mubr.msk.f32.gmra.mrb[28].mxu0 %vm1778_vm6, %v3805_v41 }
 0x535   :  { %4739 = vmatprep.mubr.msk.f32.mxu0 %vm5224_vm7, %v5222_v37 }
 0x5e5   :  { %v4659_v39 = vpop.f32.mrb[32].mxu1 }
 0x5e6   :  { %v3031_v21 = vpop.f32.mrb[33].mxu1  ;;  %v3051_v51 = vmul.f32 0.5, %v4659_v39 }
 0x5e7   :  { %v5896_v24 = vpop.f32.mrb[20].mxu0  ;;  %v3050_v57 = vmul.f32 0.5, %v3031_v21 }
 0x5e8   :  { %v4654_v35 = vpop.f32.mrb[21].mxu0  ;;  %v5917_v19 = vadd.f32 %v3051_v51, %v5616_v52 }
 0x5e9   :  { %v5922_v16 = vadd.f32 %v3050_v57, %v5621_v5 }
 0x5ea   :  { %v3061_v3 = vsel %vm433_vm1, %v5917_v19, -inf }
 0x5eb   :  { %v3058_v45 = vsel %vm433_vm1, %v5922_v16, -inf }
 0x5ed   :  { %v4662_v17 = vpop.f32.mrb[34].mxu1 }
 0x5ee   :  { %v3041_v43 = vpop.f32.mrb[35].mxu1  ;;  %v3053_v59 = vmul.f32 0.5, %v4662_v17 }
 0x5ef   :  { %v3052_v44 = vmul.f32 0.5, %v3041_v43 }
 0x5f0   :  { %v5927_v47 = vadd.f32 %v3053_v59, %v5636_v33 }
 0x5f1   :  { %v4667_v34 = vpop.f32.mrb[36].mxu1  ;;  %v5932_v15 = vadd.f32 %v3052_v44, %v5641_v25 }
 0x5f2   :  { %v3255_v56 = vmul.f32 0.5, %v4667_v34  ;;  %v3235_v60 = vpop.f32.mrb[37].mxu1  ;;  %v3067_v49 = vsel %vm433_vm1, %v5927_v47, -inf }
 0x5f3   :  { %v3254_v7 = vmul.f32 0.5, %v3235_v60  ;;  %v3064_v22 = vsel %vm433_vm1, %v5932_v15, -inf }
 0x5f4   :  { %v5899_v40 = vadd.f32 %v3255_v56, %v5616_v52 }
 0x5f5   :  { %v5902_v62 = vadd.f32 %v3254_v7, %v5621_v5  ;;  %v4697_v2 = vpop.f32.mrb[22].mxu0 }
 0x5f6   :  { %v3265_v46 = vsel %vm433_vm1, %v5899_v40, -inf  ;;  %v3609_v50 = vpop.f32.mrb[23].mxu0  ;;  %v3629_v0 = vmul.f32 0.5, %v4697_v2 }
 0x5f7   :  { %3266 = vmax.xlane.f32.xlu1 %v3265_v46  ;;  %v4670_v11 = vpop.f32.mrb[38].mxu1  ;;  %v3262_v9 = vsel %vm433_vm1, %v5902_v62, -inf  ;;  %v3628_v1 = vmul.f32 0.5, %v3609_v50 }
 0x5f8   :  { %v3257_v8 = vmul.f32 0.5, %v4670_v11  ;;  %3263 = vmax.xlane.f32.xlu0 %v3262_v9  ;;  %v3245_v10 = vpop.f32.mrb[39].mxu1  ;;  %v5935_v29 = vadd.f32 %v3629_v0, %v5616_v52 }
 0x5f9   :  { %v3256_v14 = vmul.f32 0.5, %v3245_v10  ;;  %v5938_v38 = vadd.f32 %v3628_v1, %v5621_v5 }
 0x5fa   :  { %v5909_v30 = vadd.f32 %v3257_v8, %v5636_v33  ;;  %v3639_v31 = vsel %vm433_vm1, %v5935_v29, -inf }
 0x5fb   :  { %v5912_v20 = vadd.f32 %v3256_v14, %v5641_v25  ;;  %v3636_v23 = vsel %vm433_vm1, %v5938_v38, -inf }
 0x5fc   :  { %v3271_v53 = vsel %vm433_vm1, %v5909_v30, -inf }
 0x5fd   :  { %3272 = vmax.xlane.f32.xlu1 %v3271_v53  ;;  %v3268_v12 = vsel %vm433_vm1, %v5912_v20, -inf  ;;  %v4700_v26 = vpop.f32.mrb[24].mxu0 }
 0x5fe   :  { %3269 = vmax.xlane.f32.xlu0 %v3268_v12  ;;  %v3619_v55 = vpop.f32.mrb[25].mxu0  ;;  %v3631_v42 = vmul.f32 0.5, %v4700_v26 }
 0x5ff   :  { %v3630_v48 = vmul.f32 0.5, %v3619_v55 }
 0x600   :  { %v5947_v18 = vadd.f32 %v3631_v42, %v5636_v33 }
 0x601   :  { %3062 = vmax.xlane.f32.xlu1 %v3061_v3  ;;  %v4716_v4 = vpop.f32.mrb[26].mxu0  ;;  %v5952_v41 = vadd.f32 %v3630_v48, %v5641_v25 }
 0x602   :  { %3059 = vmax.xlane.f32.xlu0 %v3058_v45  ;;  %v3899_v28 = vpop.f32.mrb[27].mxu0  ;;  %v3919_v36 = vmul.f32 0.5, %v4716_v4  ;;  %v3645_v35 = vsel %vm433_vm1, %v5947_v18, -inf }
 0x603   :  { %v3918_v6 = vmul.f32 0.5, %v3899_v28  ;;  %v3642_v34 = vsel %vm433_vm1, %v5952_v41, -inf }
 0x604   :  { %v5957_v43 = vadd.f32 %v3919_v36, %v5616_v52 }
 0x605   :  { %3068 = vmax.xlane.f32.xlu1 %v3067_v49  ;;  %v5962_v60 = vadd.f32 %v3918_v6, %v5621_v5 }
 0x606   :  { %3065 = vmax.xlane.f32.xlu0 %v3064_v22  ;;  %v3929_v7 = vsel %vm433_vm1, %v5957_v43, -inf }
 0x607   :  { %v4719_v39 = vpop.f32.mrb[28].mxu0  ;;  %v3926_v46 = vsel %vm433_vm1, %v5962_v60, -inf }
 0x608   :  { %v3909_v21 = vpop.f32.mrb[29].mxu0  ;;  %v3921_v17 = vmul.f32 0.5, %v4719_v39 }
 0x609   :  { %3640 = vmax.xlane.f32.xlu1 %v3639_v31  ;;  %v3920_v56 = vmul.f32 0.5, %v3909_v21 }
 0x60a   :  { %3637 = vmax.xlane.f32.xlu0 %v3636_v23  ;;  %v5967_v2 = vadd.f32 %v3921_v17, %v5636_v33 }
 0x60b   :  { %v5972_v52 = vadd.f32 %v3920_v56, %v5641_v25 }
 0x60c   :  { %v3935_v5 = vsel %vm433_vm1, %v5967_v2, -inf }
 0x60d   :  { %3646 = vmax.xlane.f32.xlu1 %v3645_v35  ;;  %v3932_v50 = vsel %vm433_vm1, %v5972_v52, -inf }
 0x60e   :  { %3643 = vmax.xlane.f32.xlu0 %v3642_v34 }
 0x611   :  { %3930 = vmax.xlane.f32.xlu1 %v3929_v7 }
 0x612   :  { %3927 = vmax.xlane.f32.xlu0 %v3926_v46 }
 0x615   :  { %3936 = vmax.xlane.f32.xlu1 %v3935_v5 }
 0x616   :  { %3933 = vmax.xlane.f32.xlu0 %v3932_v50 }
 0x684   :  { %v3267_v11 = vpop.xlane.xlu1 %3266 }
 0x685   :  { %v3275_v33 = vsub.f32 %v5899_v40, %v3267_v11  ;;  %v3264_v9 = vpop.xlane.xlu0 %3263 }
 0x686   :  { %v3274_v51 = vsub.f32 %v5902_v62, %v3264_v9 }
 0x687   :  { %v3280_v8 = vmul.f32 1.442695, %v3275_v33 }
 0x688   :  { %v3278_v10 = vmul.f32 1.442695, %v3274_v51 }
 0x689   :  { %5105 = vpow2.f32 %v3280_v8 }
 0x68a   :  { %5107 = vpow2.f32 %v3278_v10  ;;  %v3273_v25 = vpop.xlane.xlu1 %3272 }
 0x68b   :  { %v3277_v57 = vsub.f32 %v5909_v30, %v3273_v25  ;;  %v3270_v14 = vpop.xlane.xlu0 %3269 }
 0x68c   :  { %v3276_v59 = vsub.f32 %v5912_v20, %v3270_v14 }
 0x68d   :  { %v3284_v53 = vmul.f32 1.442695, %v3277_v57 }
 0x68e   :  { %v3282_v44 = vmul.f32 1.442695, %v3276_v59  ;;  %v3063_v12 = vpop.xlane.xlu1 %3062 }
 0x68f   :  { %5109 = vpow2.f32 %v3284_v53  ;;  %v3071_v26 = vsub.f32 %v5917_v19, %v3063_v12  ;;  %v3060_v40 = vpop.xlane.xlu0 %3059 }
 0x690   :  { %5111 = vpow2.f32 %v3282_v44  ;;  %v3070_v62 = vsub.f32 %v5922_v16, %v3060_v40 }
 0x691   :  { %v3076_v0 = vmul.f32 1.442695, %v3071_v26 }
 0x692   :  { %v3074_v55 = vmul.f32 1.442695, %v3070_v62  ;;  %v3069_v1 = vpop.xlane.xlu1 %3068 }
 0x693   :  { %v5984_v3 = vpop.eup %5105  ;;  %5113 = vpow2.f32 %v3076_v0  ;;  %v3073_v30 = vsub.f32 %v5927_v47, %v3069_v1  ;;  %v3066_v45 = vpop.xlane.xlu0 %3065 }
 0x694   :  { %v5987_v20 = vpop.eup %5107  ;;  %5115 = vpow2.f32 %v3074_v55  ;;  %v3072_v4 = vsub.f32 %v5932_v15, %v3066_v45  ;;  %v3289_v19 = vsel %vm433_vm1, %v5984_v3, 0.0 }
 0x695   :  { %v3080_v42 = vmul.f32 1.442695, %v3073_v30  ;;  %3290 = vadd.xlane.f32.xlu1 %v3289_v19  ;;  %v3286_v16 = vsel %vm433_vm1, %v5987_v20, 0.0 }
 0x696   :  { %v3078_v28 = vmul.f32 1.442695, %v3072_v4  ;;  %3287 = vadd.xlane.f32.xlu0 %v3286_v16  ;;  %v3641_v48 = vpop.xlane.xlu1 %3640 }
 0x697   :  { %5117 = vpow2.f32 %v3080_v42  ;;  %v3649_v47 = vsub.f32 %v5935_v29, %v3641_v48  ;;  %v3638_v49 = vpop.xlane.xlu0 %3637 }
 0x698   :  { %5119 = vpow2.f32 %v3078_v28  ;;  %v3648_v22 = vsub.f32 %v5938_v38, %v3638_v49 }
 0x699   :  { %v5996_v31 = vpop.eup %5109  ;;  %v3654_v15 = vmul.f32 1.442695, %v3649_v47 }
 0x69a   :  { %v5998_v36 = vpop.eup %5111  ;;  %v3652_v23 = vmul.f32 1.442695, %v3648_v22  ;;  %v3647_v6 = vpop.xlane.xlu1 %3646  ;;  %v3295_v39 = vsel %vm433_vm1, %v5996_v31, 0.0 }
 0x69b   :  { %5121 = vpow2.f32 %v3654_v15  ;;  %v3651_v21 = vsub.f32 %v5947_v18, %v3647_v6  ;;  %v3644_v35 = vpop.xlane.xlu0 %3643  ;;  %3296 = vadd.xlane.f32.xlu1 %v3295_v39  ;;  %v3292_v29 = vsel %vm433_vm1, %v5998_v36, 0.0 }
 0x69c   :  { %5123 = vpow2.f32 %v3652_v23  ;;  %v3650_v38 = vsub.f32 %v5952_v41, %v3644_v35  ;;  %3293 = vadd.xlane.f32.xlu0 %v3292_v29 }
 0x69d   :  { %v6006_v17 = vpop.eup %5113  ;;  %v3658_v34 = vmul.f32 1.442695, %v3651_v21 }
 0x69e   :  { %v6008_v56 = vpop.eup %5115  ;;  %v3656_v7 = vmul.f32 1.442695, %v3650_v38  ;;  %v3931_v46 = vpop.xlane.xlu1 %3930  ;;  %v3085_v5 = vsel %vm433_vm1, %v6006_v17, 0.0 }
 0x69f   :  { %5125 = vpow2.f32 %v3658_v34  ;;  %v3939_v18 = vsub.f32 %v5957_v43, %v3931_v46  ;;  %v3928_v50 = vpop.xlane.xlu0 %3927  ;;  %3086 = vadd.xlane.f32.xlu1 %v3085_v5  ;;  %v3082_v11 = vsel %vm433_vm1, %v6008_v56, 0.0 }
 0x6a0   :  { %5127 = vpow2.f32 %v3656_v7  ;;  %v3938_v41 = vsub.f32 %v5962_v60, %v3928_v50  ;;  %3083 = vadd.xlane.f32.xlu0 %v3082_v11 }
 0x6a1   :  { %v6016_v33 = vpop.eup %5117  ;;  %v3944_v9 = vmul.f32 1.442695, %v3939_v18 }
 0x6a2   :  { %v6018_v51 = vpop.eup %5119  ;;  %v3942_v8 = vmul.f32 1.442695, %v3938_v41  ;;  %v3937_v10 = vpop.xlane.xlu1 %3936  ;;  %v3091_v25 = vsel %vm433_vm1, %v6016_v33, 0.0 }
 0x6a3   :  { %5129 = vpow2.f32 %v3944_v9  ;;  %v3941_v43 = vsub.f32 %v5967_v2, %v3937_v10  ;;  %v3934_v57 = vpop.xlane.xlu0 %3933  ;;  %3092 = vadd.xlane.f32.xlu1 %v3091_v25  ;;  %v3088_v14 = vsel %vm433_vm1, %v6018_v51, 0.0 }
 0x6a4   :  { %5131 = vpow2.f32 %v3942_v8  ;;  %v3940_v60 = vsub.f32 %v5972_v52, %v3934_v57  ;;  %3089 = vadd.xlane.f32.xlu0 %v3088_v14 }
 0x6a5   :  { %v6026_v59 = vpop.eup %5121  ;;  %v3948_v53 = vmul.f32 1.442695, %v3941_v43 }
 0x6a6   :  { %v6028_v44 = vpop.eup %5123  ;;  %v3946_v12 = vmul.f32 1.442695, %v3940_v60  ;;  %v3663_v26 = vsel %vm433_vm1, %v6026_v59, 0.0 }
 0x6a7   :  { %5133 = vpow2.f32 %v3948_v53  ;;  %3664 = vadd.xlane.f32.xlu1 %v3663_v26  ;;  %v3660_v2 = vsel %vm433_vm1, %v6028_v44, 0.0 }
 0x6a8   :  { %5135 = vpow2.f32 %v3946_v12  ;;  %3661 = vadd.xlane.f32.xlu0 %v3660_v2 }
 0x6a9   :  { %v6034_v40 = vpop.eup %5125 }
 0x6aa   :  { %v6036_v52 = vpop.eup %5127  ;;  %v3669_v62 = vsel %vm433_vm1, %v6034_v40, 0.0 }
 0x6ab   :  { %3670 = vadd.xlane.f32.xlu1 %v3669_v62  ;;  %v3666_v0 = vsel %vm433_vm1, %v6036_v52, 0.0 }
 0x6ac   :  { %3667 = vadd.xlane.f32.xlu0 %v3666_v0 }
 0x6ad   :  { %v6042_v55 = vpop.eup %5129 }
 0x6ae   :  { %v6044_v1 = vpop.eup %5131  ;;  %v3953_v30 = vsel %vm433_vm1, %v6042_v55, 0.0 }
 0x6af   :  { %3954 = vadd.xlane.f32.xlu1 %v3953_v30  ;;  %v3950_v45 = vsel %vm433_vm1, %v6044_v1, 0.0 }
 0x6b0   :  { %3951 = vadd.xlane.f32.xlu0 %v3950_v45 }
 0x6b1   :  { %v6050_v4 = vpop.eup %5133 }
 0x6b2   :  { %v6052_v19 = vpop.eup %5135  ;;  %v3959_v42 = vsel %vm433_vm1, %v6050_v4, 0.0 }
 0x6b3   :  { %3960 = vadd.xlane.f32.xlu1 %v3959_v42  ;;  %v3956_v16 = vsel %vm433_vm1, %v6052_v19, 0.0 }
 0x6b4   :  { %3957 = vadd.xlane.f32.xlu0 %v3956_v16 }
 0x722   :  { %v3291_v28 = vpop.xlane.xlu1 %3290 }
 0x723   :  { %5137 = vrcp.f32 %v3291_v28  ;;  %v3288_v48 = vpop.xlane.xlu0 %3287 }
 0x724   :  { %5139 = vrcp.f32 %v3288_v48  ;;  %v3680_v48 = vrot.slane %v5584_v54, 1  ;;  %v3970_v54 = vrot.slane %v5586_v63, 1 }
 0x728   :  { %v3297_v47 = vpop.xlane.xlu1 %3296 }
 0x729   :  { %5141 = vrcp.f32 %v3297_v47  ;;  %v3294_v49 = vpop.xlane.xlu0 %3293 }
 0x72a   :  { %5143 = vrcp.f32 %v3294_v49 }
 0x72c   :  { %v3087_v22 = vpop.xlane.xlu1 %3086 }
 0x72d   :  { %v5138_v15 = vpop.eup %5137  ;;  %v3084_v23 = vpop.xlane.xlu0 %3083  ;;  %5145 = vrcp.f32 %v3087_v22 }
 0x72e   :  { %v5140_v6 = vpop.eup %5139  ;;  %v3303_v39 = vmul.f32 %v5138_v15, %v5984_v3  ;;  %5147 = vrcp.f32 %v3084_v23 }
 0x72f   :  { %v3302_v21 = vmul.f32 %v5140_v6, %v5987_v20 }
 0x730   :  { %v3093_v34 = vpop.xlane.xlu1 %3092 }
 0x731   :  { %v4959_v35 = vpack.c.bf16 %v3303_v39, %v3302_v21  ;;  %v3090_v5 = vpop.xlane.xlu0 %3089  ;;  %5149 = vrcp.f32 %v3093_v34  ;;  %v4093_v34 = vld [vmem:[%s6235_s9] sm:$0xff] }
 0x732   :  { %5151 = vrcp.f32 %v3090_v5 }
 0x733   :  { %v5142_v29 = vpop.eup %5141  ;;  %4961 = vmatpush3.bf16.xpose.msk.msra.mxu1 %vm5804_vm8, %v4959_v35 }
 0x734   :  { %v5144_v38 = vpop.eup %5143  ;;  %4962 = vmatprep.subr.bf16.mxu1 %v5223_v27  ;;  %v3305_v7 = vmul.f32 %v5142_v29, %v5996_v31  ;;  %v3665_v50 = vpop.xlane.xlu1 %3664  ;;  %v3306_v31 = vrot.slane %v5559_v32, 1 }
 0x735   :  { %v3304_v46 = vmul.f32 %v5144_v38, %v5998_v36  ;;  %v3662_v9 = vpop.xlane.xlu0 %3661  ;;  %5153 = vrcp.f32 %v3665_v50 }
 0x736   :  { %5155 = vrcp.f32 %v3662_v9  ;;  %v4178_v9 = vld [vmem:[%s6237_s11] sm:$0xff] }
 0x737   :  { %v5146_v3 = vpop.eup %5145  ;;  %v4963_v20 = vpack.c.bf16 %v3305_v7, %v3304_v46  ;;  %v4096_v46 = vld [vmem:[%s6235_s9 + $0x18] sm:$0xff] }
 0x738   :  { %v5148_v18 = vpop.eup %5147  ;;  %v3099_v11 = vmul.f32 %v5146_v3, %v6006_v17  ;;  %v3671_v25 = vpop.xlane.xlu1 %3670 }
 0x739   :  { %v3098_v41 = vmul.f32 %v5148_v18, %v6008_v56  ;;  %v3668_v32 = vpop.xlane.xlu0 %3667  ;;  %5157 = vrcp.f32 %v3671_v25 }
 0x73a   :  { %5159 = vrcp.f32 %v3668_v32 }
 0x73b   :  { %4965 = vmatpush3.bf16.xpose.msk.msra.mxu1 %vm5804_vm8, %v4963_v20  ;;  %v5150_v36 = vpop.eup %5149  ;;  %v4967_v8 = vpack.c.bf16 %v3099_v11, %v3098_v41  ;;  %v4468_v11 = vld [vmem:[%s6233_s7] ss:$0 sm:$0xff] }
 0x73c   :  { %4966 = vmatprep.subr.bf16.mxu1 %v5223_v27  ;;  %v5152_v10 = vpop.eup %5151  ;;  %v3101_v17 = vmul.f32 %v5150_v36, %v6016_v33  ;;  %v3955_v60 = vpop.xlane.xlu1 %3954  ;;  %v3391_v33 = vrot.slane %v5835_v13, 1  ;;  %v4469_v36 = vld [vmem:[%s6234_s8] ss:$0 sm:$0xff] }
 0x73d   :  { %v3100_v56 = vmul.f32 %v5152_v10, %v6018_v51  ;;  %v3952_v26 = vpop.xlane.xlu0 %3951  ;;  %5161 = vrcp.f32 %v3955_v60  ;;  %v4184_v60 = vld [vmem:[%s6237_s11 + $0x30] sm:$0xff] }
 0x73e   :  { %5163 = vrcp.f32 %v3952_v26  ;;  %v4187_v26 = vld [vmem:[%s6237_s11 + $0x48] sm:$0xff] }
 0x73f   :  { %v5154_v43 = vpop.eup %5153  ;;  %v4971_v57 = vpack.c.bf16 %v3101_v17, %v3100_v56  ;;  %v4180_v17 = vld [vmem:[%s6237_s11 + $0x10] sm:$0xff]  ;;  %v4181_v56 = vld [vmem:[%s6237_s11 + $0x18] sm:$0xff] }
 0x740   :  { %v5156_v14 = vpop.eup %5155  ;;  %v3677_v53 = vmul.f32 %v5154_v43, %v6026_v59  ;;  %v3961_v0 = vpop.xlane.xlu1 %3960  ;;  %v5000_v32 = vpack.c.bf16 %v4181_v56, %v4180_v17  ;;  %v4182_v43 = vld [vmem:[%s6237_s11 + $0x20] sm:$0xff] }
 0x741   :  { %v3676_v12 = vmul.f32 %v5156_v14, %v6028_v44  ;;  %v3958_v13 = vpop.xlane.xlu0 %3957  ;;  %5165 = vrcp.f32 %v3961_v0  ;;  %v4190_v0 = vld [vmem:[%s6237_s11 + $0x60] sm:$0xff] }
 0x742   :  { %4680 = vmatmul.mubr.msk.f32.vlgmr.msra.gmra.mrb[40].mxu1 %vm433_vm1, %v3306_v31  ;;  %5167 = vrcp.f32 %v3958_v13  ;;  %v4179_v31 = vld [vmem:[%s6237_s11 + $0x8] sm:$0xff]  ;;  %v4192_v13 = vld [vmem:[%s6237_s11 + $0x70] sm:$0xff] }
 0x743   :  { %4969 = vmatpush3.bf16.xpose.msk.msra.mxu1 %vm5804_vm8, %v4967_v8  ;;  %4690 = vmatprep.mubr.msk.f32.mxu1 %vm5224_vm7, %v5222_v37  ;;  %v5158_v51 = vpop.eup %5157  ;;  %v4975_v2 = vpack.c.bf16 %v3677_v53, %v3676_v12  ;;  %v4997_v10 = vpack.c.bf16 %v4179_v31, %v4178_v9  ;;  %v4186_v12 = vld [vmem:[%s6237_s11 + $0x40] sm:$0xff] }
 0x744   :  { %4970 = vmatprep.subr.bf16.mxu1 %v5223_v27  ;;  %v5160_v62 = vpop.eup %5159  ;;  %v3679_v59 = vmul.f32 %v5158_v51, %v6034_v40  ;;  %v4188_v51 = vld [vmem:[%s6237_s11 + $0x50] sm:$0xff] }
 0x745   :  { %v3678_v44 = vmul.f32 %v5160_v62, %v6036_v52 }
 0x747   :  { %v5162_v30 = vpop.eup %5161  ;;  %v4979_v45 = vpack.c.bf16 %v3679_v59, %v3678_v44  ;;  %v4191_v59 = vld [vmem:[%s6237_s11 + $0x68] sm:$0xff] }
 0x748   :  { %v5164_v42 = vpop.eup %5163  ;;  %v3967_v16 = vmul.f32 %v5162_v30, %v6042_v55  ;;  %v5015_v44 = vpack.c.bf16 %v4191_v59, %v4190_v0  ;;  %v4193_v30 = vld [vmem:[%s6237_s11 + $0x78] sm:$0xff] }
 0x749   :  { %v3966_v28 = vmul.f32 %v5164_v42, %v6044_v1  ;;  %v4470_v42 = vld [vmem:[%s6236_s10] ss:$0 sm:$0xff] }
 0x74b   :  { %4973 = vmatpush3.bf16.xpose.msk.msra.mxu1 %vm5804_vm8, %v4971_v57  ;;  %v5166_v40 = vpop.eup %5165  ;;  %v4983_v47 = vpack.c.bf16 %v3967_v16, %v3966_v28  ;;  %v4183_v57 = vld [vmem:[%s6237_s11 + $0x28] sm:$0xff] }
 0x74c   :  { %4974 = vmatprep.subr.bf16.mxu1 %v5223_v27  ;;  %v5168_v52 = vpop.eup %5167  ;;  %v3969_v49 = vmul.f32 %v5166_v40, %v6050_v4  ;;  %v4061_v4 = vstv %s6232_s6  ;;  %v5003_v14 = vpack.c.bf16 %v4183_v57, %v4182_v43  ;;  %s5197_s6 = scalar_lea.vmem %s4360_s2, 32 }
 0x74d   :  { %v3968_v55 = vmul.f32 %v5168_v52, %v6052_v19 }
 0x74f   :  { %v4987_v1 = vpack.c.bf16 %v3969_v49, %v3968_v55 }
 0x752   :  { %4691 = vmatmul.mubr.msk.f32.vlgmr.msra.gmra.mrb[40].mxu1 %vm433_vm1, %v3391_v33  ;;  %v5009_v33 = vpack.c.bf16 %v4187_v26, %v4186_v12 }
 0x753   :  { %4977 = vmatpush3.bf16.xpose.msk.msra.mxu1 %vm5804_vm8, %v4975_v2  ;;  %4709 = vmatprep.mubr.msk.f32.mxu1 %vm5224_vm7, %v5222_v37  ;;  %v4189_v2 = vld [vmem:[%s6237_s11 + $0x58] sm:$0xff] }
 0x754   :  { %4978 = vmatprep.subr.bf16.mxu1 %v5223_v27  ;;  %v5012_v62 = vpack.c.bf16 %v4189_v2, %v4188_v51 }
 0x75b   :  { %4981 = vmatpush3.bf16.xpose.msk.msra.mxu1 %vm5804_vm8, %v4979_v45  ;;  %v5018_v45 = vpack.c.bf16 %v4193_v30, %v4192_v13 }
 0x75c   :  { %4982 = vmatprep.subr.bf16.mxu1 %v5223_v27 }
 0x762   :  { %4710 = vmatmul.mubr.msk.f32.vlgmr.msra.gmra.mrb[40].mxu1 %vm433_vm1, %v3680_v48 }
 0x763   :  { %4985 = vmatpush3.bf16.xpose.msk.msra.mxu1 %vm5804_vm8, %v4983_v47  ;;  %4728 = vmatprep.mubr.msk.f32.mxu1 %vm5224_vm7, %v5222_v37 }
 0x764   :  { %4986 = vmatprep.subr.bf16.mxu1 %v5223_v27 }
 0x76b   :  { %4989 = vmatpush3.bf16.xpose.msk.msra.mxu1 %vm5804_vm8, %v4987_v1  ;;  %v4272_v1 = vld [vmem:[%s6239_s13] sm:$0x1] }
 0x76c   :  { %4777 = vmatprep.subr.mxu1 %v5222_v37 }
 0x772   :  { %4729 = vmatmul.mubr.msk.f32.vlgmr.msra.gmra.mrb[40].mxu1 %vm433_vm1, %v3970_v54  ;;  %v4274_v54 = vstv %s6240_s14 }
 0x773   :  { %4779 = vmatprep.mubr.msk.f32.mxu1 %vm5224_vm7, %v5222_v37 }
 0x845   :  { %v4051_v22 = vpop.f32.mrb[40].mxu1 }
 0x846   :  { %v4057_v15 = vrot.slane %v4051_v22, 7  ;;  %v4730_v23 = vpop.f32.mrb[41].mxu1 }
 0x848   :  { %v4059_v61 = vsel %vm1728_vm2, %v5896_v24, %v4057_v15  ;;  %v4094_v24 = vld [vmem:[%s6235_s9 + $0x8] sm:$0xff] }
 0x849   :  { %v4062_v19 = vadd.f32 %v4061_v4, %v4059_v61  ;;  %v4991_v7 = vpack.c.bf16 %v4094_v24, %v4093_v34 }
 0x84b   :  { %v4063_v6 = vadd.f32 %v4062_v19, %v5331_v58  ;;  %4992 = vmatpush3.bf16.msra.mxu0 %v4991_v7  ;;  %v4095_v58 = vld [vmem:[%s6235_s9 + $0x10] sm:$0xff] }
 0x84c   :  { %4993 = vmatprep.subr.bf16.mxu0 %v5223_v27  ;;  %v4994_v5 = vpack.c.bf16 %v4096_v46, %v4095_v58 }
 0x84d   :  { %v4066_v63 = vsel %vm70_vm0, %v4063_v6, 0.0 }
 0x84e   :  { %4067 = vadd.xlane.f32.xlu0 %v4066_v63 }
 0x84f   :  { %4995 = vmatpush3.bf16.msra.mxu0 %v4994_v5 }
 0x850   :  { %4996 = vmatprep.subr.bf16.mxu0 %v5223_v27 }
 0x8db   :  { %v4068_v39 = vpop.xlane.xlu0 %4067 }
 0x8dc   :  { %v4069_v21 = vmul.f32 0.03125, %v4068_v39 }
 0x8de   :  { %v4070_v35 = vsub.f32 %v4063_v6, %v4069_v21 }
 0x8e0   :  { %v4071_v29 = vmul.f32 %v4070_v35, %v4070_v35 }
 0x8e2   :  { %v4072_v38 = vsel %vm70_vm0, %v4071_v29, 0.0 }
 0x8e3   :  { %4073 = vadd.xlane.f32.xlu1 %v4072_v38 }
 0x970   :  { %v4074_v3 = vpop.xlane.xlu1 %4073 }
 0x971   :  { %v4075_v20 = vmul.f32 0.03125, %v4074_v3 }
 0x973   :  { %v4076_v18 = vadd.f32 1e-05, %v4075_v20 }
 0x975   :  { %5169 = vrsqrt.f32 %v4076_v18 }
 0x97f   :  { %v5170_v50 = vpop.eup %5169 }
 0x980   :  { %v4078_v41 = vmul.f32 %v5170_v50, %v4070_v35 }
 0x982   :  { %v4085_v8 = vmul.f32 %v4468_v11, %v4078_v41 }
 0x984   :  { %v4092_v25 = vadd.f32 %v4469_v36, %v4085_v8 }
 0x986   :  { %4740 = vmatmul.mubr.msk.f32.vlgmr.msra.gmra.mrb[30].mxu0 %vm433_vm1, %v4092_v25 }
 0x987   :  { %4998 = vmatpush3.bf16.msra.mxu0 %v4997_v10  ;;  %4774 = vmatprep.mubr.msk.f32.mxu0 %vm5224_vm7, %v5222_v37  ;;  %v4185_v37 = vld [vmem:[%s6237_s11 + $0x38] sm:$0xff] }
 0x988   :  { %4999 = vmatprep.subr.bf16.mxu0 %v5223_v27  ;;  %v5006_v53 = vpack.c.bf16 %v4185_v37, %v4184_v60 }
 0x98b   :  { %5001 = vmatpush3.bf16.msra.mxu0 %v5000_v32 }
 0x98c   :  { %5002 = vmatprep.subr.bf16.mxu0 %v5223_v27 }
 0x98f   :  { %5004 = vmatpush3.bf16.msra.mxu0 %v5003_v14 }
 0x990   :  { %5005 = vmatprep.subr.bf16.mxu0 %v5223_v27 }
 0x993   :  { %5007 = vmatpush3.bf16.msra.mxu0 %v5006_v53 }
 0x994   :  { %5008 = vmatprep.subr.bf16.mxu0 %v5223_v27 }
 0x997   :  { %5010 = vmatpush3.bf16.msra.mxu0 %v5009_v33 }
 0x998   :  { %5011 = vmatprep.subr.bf16.mxu0 %v5223_v27 }
 0x99b   :  { %5013 = vmatpush3.bf16.msra.mxu0 %v5012_v62 }
 0x99c   :  { %5014 = vmatprep.subr.bf16.mxu0 %v5223_v27 }
 0x99f   :  { %5016 = vmatpush3.bf16.msra.mxu0 %v5015_v44 }
 0x9a0   :  { %5017 = vmatprep.subr.bf16.mxu0 %v5223_v27  ;;  %v4472_v27 = vld [vmem:[%s6238_s12] ss:$0 sm:$0xff]  ;;  %s5193_s12 = scalar_lea.vmem %s4360_s2, 16 }
 0x9a1   :  { %p5194_p8 = scmp.ne.s32.totalorder %s4360_s2, %s5193_s12  ;;  %p5199_p10 = scmp.lt.s32.totalorder %s5197_s6, %s5193_s12 }
 0x9a3   :  { %5019 = vmatpush3.bf16.msra.mxu0 %v5018_v45  ;;  %p5200_p11 = por %p5199_p10, %p5198_p9 }
 0x9a5   :  { %p5201_p12 = pnand %p5200_p11, %p5194_p8 }
 0xa59   :  { %v4173_v16 = vpop.f32.mrb[30].mxu0 }
 0xa5a   :  { %v4174_v28 = vadd.f32 %v4470_v42, %v4173_v16  ;;  %v4741_v48 = vpop.f32.mrb[31].mxu0 }
 0xa5c   :  { %v4177_v40 = vmax.f32 %v4174_v28, 0.0 }
 0xa5e   :  { %4775 = vmatmul.mubr.f32.vlgmr.msra.gmra.mrb[32].mxu0 %v4177_v40 }
 0xb31   :  { %v4267_v47 = vpop.f32.mrb[32].mxu0 }
 0xb32   :  { %v4268_v52 = vadd.f32 %v4472_v27, %v4267_v47  ;;  %v4776_v49 = vpop.f32.mrb[33].mxu0 }
 0xb34   :  { %v4271_v55 = vadd.f32 %v4268_v52, %v4092_v25 }
 0xb36   :  { %4778 = vmatpush3.xpose.msk.msra.mxu1 %vm433_vm1, %v4271_v55 }
 0xb39   :  { %4780 = vmatmul.mubr.msk.f32.vlgmr.msra.gmra.mrb[42].mxu1 %vm433_vm1, %v4272_v1 }
 0xc0c   :  { %v4347_v22 = vpop.f32.mrb[42].mxu1 }
 0xc0d   :  { %v4348_v15 = vadd.f32 %v4347_v22, %v4274_v54  ;;  %v4781_v23 = vpop.f32.mrb[43].mxu1 }
 0xc0f   :  { %4352 = vst.msk [vmem:[#allocation7] sm:$0x1] %vm4351_vm9, %v4348_v15 }
 0xc10   :  { %5204 = shalt.err (!%p5201_p12)
}
 0xc11   :  { %s5205_s14 = scalar_lea.hbm %s6241_s15, 16 }
 0xc12   :  { %p5206_p13 = scmp.ne.s32.totalorder %s6241_s15, %s5205_s14  ;;  %p5209_p0 = scmp.lt.u32.totalorder %s5205_s14, %s6241_s15 }
 0xc14   :  { %p5211_p1 = pnand %p5209_p0, %p5206_p13 }
 0xc16   :  { %5214 = shalt.err (!%p5211_p1)
}
 0xc17   :  { %4362 = dma.vmem_to_hbm [thread:$0]  %s4360_s2, 16, %s6241_s15, [#allocation6]  }
 0xc18   :  { %5217 = dma.done.wait [#allocation6], 16  }
 0xc19   :  { %5218 = vsyncadd [#allocation6], 4294967280 }
 0xc1a   :  { %4366 = vsyncpa [#allocation5], 1 }
 0xc1b   :  { %4367 = vsyncpa [#allocation6], 1 }

</bundles_post_ra>
